<compile_context>
chip_gen: v7x
topology: tpu7x:2x2x1
jax: 0.10.0
libtpu: 0.0.40
codegen_flags: <defaults>
</compile_context>

<pallas_src>
import jax
import jax.numpy as jnp
from jax.experimental import pallas as pl
from jax.experimental.pallas import tpu as pltpu

SELU_ALPHA = 1.6732632423543772
SELU_SCALE = 1.0507009873554805
BN_EPS = 1e-5


def _selu_unscaled(x):
    # SELU without the outer scale (scale is folded into downstream weights).
    # Clamp the exp argument so the unselected branch never produces inf.
    return jnp.where(x > 0, x, SELU_ALPHA * (jnp.exp(jnp.minimum(x, 0.0)) - 1.0))


def dnn_kernel(x_ref,
               w1, b1, w2, b2, w3, b3, w4, b4, w5, b5, w6, b6, w7, b7,
               out_ref):
    # x_ref: (TB, n_features) f32 tile, natural layout (no wrapper transpose).
    # w1..w6: (out, in) bf16, resident. w7: (n_hidden, 1) f32, resident.
    # b_i:    (out, 1) f32, resident.  All activations are (n_hidden, TB).
    x_bf = x_ref[...].astype(jnp.bfloat16)
    # layer1: contract the feature axes so the MXU handles the "transpose".
    h = jax.lax.dot_general(w1[...], x_bf, (((1,), (1,)), ((), ())),
                            preferred_element_type=jnp.float32) + b1[...]
    h = _selu_unscaled(h)

    def layer(w_ref, b_ref, h_f32):
        acc = jnp.dot(w_ref[...], h_f32.astype(jnp.bfloat16),
                      preferred_element_type=jnp.float32)
        return acc + b_ref[...]              # (out, TB) f32, lane-dense

    # batch_norm1 (eval) + SELU scale folded into w2/b2 in the wrapper.
    h = _selu_unscaled(layer(w2, b2, h))     # layer2 + SELU
    h = _selu_unscaled(layer(w3, b3, h))     # layer3 + SELU
    # dropout (eval mode): identity
    h = _selu_unscaled(layer(w4, b4, h))     # layer4 + SELU
    h = _selu_unscaled(layer(w5, b5, h))     # layer5 + SELU
    h = _selu_unscaled(layer(w6, b6, h))     # layer6 + SELU
    # layer7 (1 x H): broadcast-multiply + sublane reduce (VPU/XLU), no MXU.
    logits = jnp.sum(w7[...] * h, axis=0, keepdims=True) + b7[...]   # (1, TB)
    out_ref[...] = jax.nn.sigmoid(logits)    # lane-dense store


def init_params(key, n_features, n_hidden):
    """Deterministic PyTorch-style init; weights stored (out, in), biases (out, 1)."""
    dims = [(n_hidden, n_features)] + [(n_hidden, n_hidden)] * 5 + [(1, n_hidden)]
    params = {}
    for i, (fan_out, fan_in) in enumerate(dims, start=1):
        key, kw, kb = jax.random.split(key, 3)
        bound = 1.0 / (fan_in ** 0.5)
        params[f"w{i}"] = jax.random.uniform(kw, (fan_out, fan_in), jnp.float32,
                                             -bound, bound)
        params[f"b{i}"] = jax.random.uniform(kb, (fan_out, 1), jnp.float32,
                                             -bound, bound)
    # BatchNorm1d affine params + running stats (deterministic, non-trivial).
    key, kg, kb2, km, kv = jax.random.split(key, 5)
    params["gamma"] = 1.0 + 0.1 * jax.random.normal(kg, (n_hidden, 1), jnp.float32)
    params["beta"] = 0.1 * jax.random.normal(kb2, (n_hidden, 1), jnp.float32)
    params["running_mean"] = 0.1 * jax.random.normal(km, (n_hidden, 1), jnp.float32)
    params["running_var"] = jnp.abs(
        1.0 + 0.1 * jax.random.normal(kv, (n_hidden, 1), jnp.float32))
    return params


def _fold_params(p):
    """Fold eval-mode BN and the SELU output scale into the weights.

    The kernel uses an *unscaled* SELU, so every weight that consumes a SELU
    output absorbs SELU_SCALE; layer2 additionally absorbs the BN affine.
    """
    inv_std = jax.lax.rsqrt(p["running_var"] + BN_EPS)       # (H, 1)
    s_bn = p["gamma"] * inv_std                              # (H, 1)
    t_bn = p["beta"] - p["running_mean"] * s_bn              # (H, 1)
    w2f = p["w2"] * (SELU_SCALE * s_bn).T                    # scale input columns
    b2f = p["w2"] @ t_bn + p["b2"]
    ws = [p["w1"], w2f] + [SELU_SCALE * p[f"w{i}"] for i in (3, 4, 5, 6)]
    bs = [p["b1"], b2f, p["b3"], p["b4"], p["b5"], p["b6"]]
    w7col = (SELU_SCALE * p["w7"]).T                         # (H, 1) f32 for VPU path
    b7 = p["b7"]                                             # (1, 1)
    return ws, bs, w7col, b7


def dnn_forward(x, params, *, tb=None):
    B, n_features = x.shape
    n_hidden = params["w1"].shape[0]

    ws, bs, w7col, b7 = _fold_params(params)

    if tb is None:
        # Two balanced grid steps (even grid -> both TCs on v7x); tb a multiple
        # of 512 keeps the N dimension spread across v5e's 4 MXUs.  Working set
        # per tile is ~100 KB -- far under VMEM on every generation.
        tb = max(512, pl.cdiv(pl.cdiv(B, 2), 512) * 512)
    grid_n = pl.cdiv(B, tb)
    Bp = grid_n * tb

    # Streamed input in its natural layout: ragged last block is safe because
    # all ops are column-independent and padded columns are sliced off below.
    args = [x]
    in_specs = [pl.BlockSpec((tb, n_features), lambda i: (i, 0))]
    for w, b in zip(ws, bs):
        args += [w.astype(jnp.bfloat16), b.astype(jnp.float32)]
        in_specs += [
            pl.BlockSpec(w.shape, lambda i: (0, 0)),   # resident weight (bf16)
            pl.BlockSpec(b.shape, lambda i: (0, 0)),   # resident bias   (f32)
        ]
    args += [w7col.astype(jnp.float32), b7.astype(jnp.float32)]
    in_specs += [
        pl.BlockSpec(w7col.shape, lambda i: (0, 0)),   # resident layer7 weight (f32)
        pl.BlockSpec(b7.shape, lambda i: (0, 0)),      # resident layer7 bias   (f32)
    ]

    flops = 2 * Bp * (n_features * n_hidden + 5 * n_hidden * n_hidden + n_hidden)
    transcendentals = Bp * (6 * n_hidden + 1)
    bytes_accessed = (x.size * 4 + Bp * 4
                      + sum(int(w.size) * 2 for w in ws)
                      + sum(int(b.size) * 4 for b in bs)
                      + int(w7col.size) * 4 + int(b7.size) * 4)

    out = pl.pallas_call(
        dnn_kernel,
        out_shape=jax.ShapeDtypeStruct((1, Bp), jnp.float32),
        grid=(grid_n,),
        in_specs=in_specs,
        out_specs=pl.BlockSpec((1, tb), lambda i: (0, i)),
        compiler_params=pltpu.CompilerParams(
            dimension_semantics=("parallel",)),
        cost_estimate=pl.CostEstimate(
            flops=flops, transcendentals=transcendentals,
            bytes_accessed=bytes_accessed),
    )(*args)
    # (1, Bp) lane-major -> (B, 1) to match the PyTorch module's output shape.
    return out[0, :B].reshape(B, 1)


def dnn_reference(x, p):
    """Pure-JAX f32 reference matching PyTorch eval() semantics (unfolded)."""
    def lin(h, w, b):
        return h @ w.T + b[:, 0]

    def selu(v):
        return SELU_SCALE * jnp.where(v > 0, v, SELU_ALPHA * (jnp.exp(jnp.minimum(v, 0.0)) - 1.0))

    h = selu(lin(x, p["w1"], p["b1"]))
    inv_std = jax.lax.rsqrt(p["running_var"][:, 0] + BN_EPS)
    h = (h - p["running_mean"][:, 0]) * (p["gamma"][:, 0] * inv_std) + p["beta"][:, 0]
    h = selu(lin(h, p["w2"], p["b2"]))
    h = selu(lin(h, p["w3"], p["b3"]))
    h = selu(lin(h, p["w4"], p["b4"]))
    h = selu(lin(h, p["w5"], p["b5"]))
    h = selu(lin(h, p["w6"], p["b6"]))
    return jax.nn.sigmoid(lin(h, p["w7"], p["b7"]))


if __name__ == "__main__":
    # B not a multiple of the tile -> exercises the ragged-last-block path;
    # two balanced grid steps (tb=512) -> v7x can use both TensorCores.
    B, N_FEATURES, N_HIDDEN = 1000, 16, 32

    key = jax.random.PRNGKey(0)
    key, kx = jax.random.split(key)
    x = jax.random.normal(kx, (B, N_FEATURES), jnp.float32)
    params = init_params(key, N_FEATURES, N_HIDDEN)

    out = jax.block_until_ready(dnn_forward(x, params))
    ref = dnn_reference(x, params)

    assert out.shape == (B, 1)
    # bf16 matmul inputs (f32 accumulation) vs pure-f32 reference -> loose tol.
    max_err = float(jnp.max(jnp.abs(out - ref)))
    assert jnp.allclose(out, ref, atol=2e-2, rtol=2e-2), max_err

    print("KERNEL_OK")
</pallas_src>

<mosaic_0001>
module attributes {stable_mosaic.version = 11 : i64} {
  func.func @dnn_kernel(%arg0: i32, %arg1: memref<512x16xf32, #tpu.memory_space<vmem>>, %arg2: memref<32x16xbf16, #tpu.memory_space<vmem>>, %arg3: memref<32x1xf32, #tpu.memory_space<vmem>>, %arg4: memref<32x32xbf16, #tpu.memory_space<vmem>>, %arg5: memref<32x1xf32, #tpu.memory_space<vmem>>, %arg6: memref<32x32xbf16, #tpu.memory_space<vmem>>, %arg7: memref<32x1xf32, #tpu.memory_space<vmem>>, %arg8: memref<32x32xbf16, #tpu.memory_space<vmem>>, %arg9: memref<32x1xf32, #tpu.memory_space<vmem>>, %arg10: memref<32x32xbf16, #tpu.memory_space<vmem>>, %arg11: memref<32x1xf32, #tpu.memory_space<vmem>>, %arg12: memref<32x32xbf16, #tpu.memory_space<vmem>>, %arg13: memref<32x1xf32, #tpu.memory_space<vmem>>, %arg14: memref<32x1xf32, #tpu.memory_space<vmem>>, %arg15: memref<1x1xf32, #tpu.memory_space<vmem>>, %arg16: memref<1x512xf32, #tpu.memory_space<vmem>>) attributes {dimension_semantics = [#tpu.dimension_semantics<parallel>], iteration_bounds = array<i64: 2>, scalar_prefetch = 0 : i64, scratch_operands = 0 : i64, tpu.core_type = #tpu.core_type<tc>, window_params = [{transform_indices = @transform_0, window_bounds = array<i64: 512, 16>}, {pipeline_mode = #tpu.pipeline_mode<synchronous>, transform_indices = @transform_1, window_bounds = array<i64: 32, 16>}, {pipeline_mode = #tpu.pipeline_mode<synchronous>, transform_indices = @transform_2, window_bounds = array<i64: 32, 1>}, {pipeline_mode = #tpu.pipeline_mode<synchronous>, transform_indices = @transform_3, window_bounds = array<i64: 32, 32>}, {pipeline_mode = #tpu.pipeline_mode<synchronous>, transform_indices = @transform_4, window_bounds = array<i64: 32, 1>}, {pipeline_mode = #tpu.pipeline_mode<synchronous>, transform_indices = @transform_5, window_bounds = array<i64: 32, 32>}, {pipeline_mode = #tpu.pipeline_mode<synchronous>, transform_indices = @transform_6, window_bounds = array<i64: 32, 1>}, {pipeline_mode = #tpu.pipeline_mode<synchronous>, transform_indices = @transform_7, window_bounds = array<i64: 32, 32>}, {pipeline_mode = #tpu.pipeline_mode<synchronous>, transform_indices = @transform_8, window_bounds = array<i64: 32, 1>}, {pipeline_mode = #tpu.pipeline_mode<synchronous>, transform_indices = @transform_9, window_bounds = array<i64: 32, 32>}, {pipeline_mode = #tpu.pipeline_mode<synchronous>, transform_indices = @transform_10, window_bounds = array<i64: 32, 1>}, {pipeline_mode = #tpu.pipeline_mode<synchronous>, transform_indices = @transform_11, window_bounds = array<i64: 32, 32>}, {pipeline_mode = #tpu.pipeline_mode<synchronous>, transform_indices = @transform_12, window_bounds = array<i64: 32, 1>}, {pipeline_mode = #tpu.pipeline_mode<synchronous>, transform_indices = @transform_13, window_bounds = array<i64: 32, 1>}, {pipeline_mode = #tpu.pipeline_mode<synchronous>, transform_indices = @transform_14, window_bounds = array<i64: 1, 1>}, {transform_indices = @transform_15, window_bounds = array<i64: 1, 512>}]} {
    %c0 = arith.constant 0 : index
    %c0_0 = arith.constant 0 : index
    %0 = vector.load %arg1[%c0, %c0_0] : memref<512x16xf32, #tpu.memory_space<vmem>>, vector<512x16xf32>
    %1 = arith.truncf %0 : vector<512x16xf32> to vector<512x16xbf16>
    %c0_1 = arith.constant 0 : index
    %c0_2 = arith.constant 0 : index
    %2 = vector.load %arg2[%c0_1, %c0_2] : memref<32x16xbf16, #tpu.memory_space<vmem>>, vector<32x16xbf16>
    %cst = arith.constant dense<0.000000e+00> : vector<32x512xf32>
    %3 = tpu.matmul %2, %1, %cst {dimension_numbers = #tpu.dot_dimension_numbers<[1], [1], [0], [0], [0, 0, 1, 0], [], []>} : vector<32x16xbf16>, vector<512x16xbf16>, vector<32x512xf32> -> vector<32x512xf32>
    %c0_3 = arith.constant 0 : index
    %c0_4 = arith.constant 0 : index
    %4 = vector.load %arg3[%c0_3, %c0_4] : memref<32x1xf32, #tpu.memory_space<vmem>>, vector<32x1xf32>
    %5 = vector.broadcast %4 : vector<32x1xf32> to vector<32x512xf32>
    %6 = arith.addf %3, %5 : vector<32x512xf32>
    %cst_5 = arith.constant 0.000000e+00 : f32
    %7 = vector.broadcast %cst_5 : f32 to vector<32x512xf32>
    %8 = arith.cmpf ogt, %6, %7 : vector<32x512xf32>
    %cst_6 = arith.constant 0.000000e+00 : f32
    %9 = vector.broadcast %cst_6 : f32 to vector<32x512xf32>
    %10 = arith.minimumf %6, %9 : vector<32x512xf32>
    %11 = math.exp %10 : vector<32x512xf32>
    %cst_7 = arith.constant 1.000000e+00 : f32
    %12 = vector.broadcast %cst_7 : f32 to vector<32x512xf32>
    %13 = arith.subf %11, %12 : vector<32x512xf32>
    %cst_8 = arith.constant 1.67326319 : f32
    %14 = vector.broadcast %cst_8 : f32 to vector<32x512xf32>
    %15 = arith.mulf %14, %13 : vector<32x512xf32>
    %16 = arith.select %8, %6, %15 : vector<32x512xi1>, vector<32x512xf32>
    %c0_9 = arith.constant 0 : index
    %c0_10 = arith.constant 0 : index
    %17 = vector.load %arg4[%c0_9, %c0_10] : memref<32x32xbf16, #tpu.memory_space<vmem>>, vector<32x32xbf16>
    %18 = arith.truncf %16 : vector<32x512xf32> to vector<32x512xbf16>
    %cst_11 = arith.constant dense<0.000000e+00> : vector<32x512xf32>
    %19 = tpu.matmul %17, %18, %cst_11 {dimension_numbers = #tpu.dot_dimension_numbers<[1], [0], [0], [1], [0, 0, 1, 1], [], []>} : vector<32x32xbf16>, vector<32x512xbf16>, vector<32x512xf32> -> vector<32x512xf32>
    %c0_12 = arith.constant 0 : index
    %c0_13 = arith.constant 0 : index
    %20 = vector.load %arg5[%c0_12, %c0_13] : memref<32x1xf32, #tpu.memory_space<vmem>>, vector<32x1xf32>
    %21 = vector.broadcast %20 : vector<32x1xf32> to vector<32x512xf32>
    %22 = arith.addf %19, %21 : vector<32x512xf32>
    %cst_14 = arith.constant 0.000000e+00 : f32
    %23 = vector.broadcast %cst_14 : f32 to vector<32x512xf32>
    %24 = arith.cmpf ogt, %22, %23 : vector<32x512xf32>
    %cst_15 = arith.constant 0.000000e+00 : f32
    %25 = vector.broadcast %cst_15 : f32 to vector<32x512xf32>
    %26 = arith.minimumf %22, %25 : vector<32x512xf32>
    %27 = math.exp %26 : vector<32x512xf32>
    %cst_16 = arith.constant 1.000000e+00 : f32
    %28 = vector.broadcast %cst_16 : f32 to vector<32x512xf32>
    %29 = arith.subf %27, %28 : vector<32x512xf32>
    %cst_17 = arith.constant 1.67326319 : f32
    %30 = vector.broadcast %cst_17 : f32 to vector<32x512xf32>
    %31 = arith.mulf %30, %29 : vector<32x512xf32>
    %32 = arith.select %24, %22, %31 : vector<32x512xi1>, vector<32x512xf32>
    %c0_18 = arith.constant 0 : index
    %c0_19 = arith.constant 0 : index
    %33 = vector.load %arg6[%c0_18, %c0_19] : memref<32x32xbf16, #tpu.memory_space<vmem>>, vector<32x32xbf16>
    %34 = arith.truncf %32 : vector<32x512xf32> to vector<32x512xbf16>
    %cst_20 = arith.constant dense<0.000000e+00> : vector<32x512xf32>
    %35 = tpu.matmul %33, %34, %cst_20 {dimension_numbers = #tpu.dot_dimension_numbers<[1], [0], [0], [1], [0, 0, 1, 1], [], []>} : vector<32x32xbf16>, vector<32x512xbf16>, vector<32x512xf32> -> vector<32x512xf32>
    %c0_21 = arith.constant 0 : index
    %c0_22 = arith.constant 0 : index
    %36 = vector.load %arg7[%c0_21, %c0_22] : memref<32x1xf32, #tpu.memory_space<vmem>>, vector<32x1xf32>
    %37 = vector.broadcast %36 : vector<32x1xf32> to vector<32x512xf32>
    %38 = arith.addf %35, %37 : vector<32x512xf32>
    %cst_23 = arith.constant 0.000000e+00 : f32
    %39 = vector.broadcast %cst_23 : f32 to vector<32x512xf32>
    %40 = arith.cmpf ogt, %38, %39 : vector<32x512xf32>
    %cst_24 = arith.constant 0.000000e+00 : f32
    %41 = vector.broadcast %cst_24 : f32 to vector<32x512xf32>
    %42 = arith.minimumf %38, %41 : vector<32x512xf32>
    %43 = math.exp %42 : vector<32x512xf32>
    %cst_25 = arith.constant 1.000000e+00 : f32
    %44 = vector.broadcast %cst_25 : f32 to vector<32x512xf32>
    %45 = arith.subf %43, %44 : vector<32x512xf32>
    %cst_26 = arith.constant 1.67326319 : f32
    %46 = vector.broadcast %cst_26 : f32 to vector<32x512xf32>
    %47 = arith.mulf %46, %45 : vector<32x512xf32>
    %48 = arith.select %40, %38, %47 : vector<32x512xi1>, vector<32x512xf32>
    %c0_27 = arith.constant 0 : index
    %c0_28 = arith.constant 0 : index
    %49 = vector.load %arg8[%c0_27, %c0_28] : memref<32x32xbf16, #tpu.memory_space<vmem>>, vector<32x32xbf16>
    %50 = arith.truncf %48 : vector<32x512xf32> to vector<32x512xbf16>
    %cst_29 = arith.constant dense<0.000000e+00> : vector<32x512xf32>
    %51 = tpu.matmul %49, %50, %cst_29 {dimension_numbers = #tpu.dot_dimension_numbers<[1], [0], [0], [1], [0, 0, 1, 1], [], []>} : vector<32x32xbf16>, vector<32x512xbf16>, vector<32x512xf32> -> vector<32x512xf32>
    %c0_30 = arith.constant 0 : index
    %c0_31 = arith.constant 0 : index
    %52 = vector.load %arg9[%c0_30, %c0_31] : memref<32x1xf32, #tpu.memory_space<vmem>>, vector<32x1xf32>
    %53 = vector.broadcast %52 : vector<32x1xf32> to vector<32x512xf32>
    %54 = arith.addf %51, %53 : vector<32x512xf32>
    %cst_32 = arith.constant 0.000000e+00 : f32
    %55 = vector.broadcast %cst_32 : f32 to vector<32x512xf32>
    %56 = arith.cmpf ogt, %54, %55 : vector<32x512xf32>
    %cst_33 = arith.constant 0.000000e+00 : f32
    %57 = vector.broadcast %cst_33 : f32 to vector<32x512xf32>
    %58 = arith.minimumf %54, %57 : vector<32x512xf32>
    %59 = math.exp %58 : vector<32x512xf32>
    %cst_34 = arith.constant 1.000000e+00 : f32
    %60 = vector.broadcast %cst_34 : f32 to vector<32x512xf32>
    %61 = arith.subf %59, %60 : vector<32x512xf32>
    %cst_35 = arith.constant 1.67326319 : f32
    %62 = vector.broadcast %cst_35 : f32 to vector<32x512xf32>
    %63 = arith.mulf %62, %61 : vector<32x512xf32>
    %64 = arith.select %56, %54, %63 : vector<32x512xi1>, vector<32x512xf32>
    %c0_36 = arith.constant 0 : index
    %c0_37 = arith.constant 0 : index
    %65 = vector.load %arg10[%c0_36, %c0_37] : memref<32x32xbf16, #tpu.memory_space<vmem>>, vector<32x32xbf16>
    %66 = arith.truncf %64 : vector<32x512xf32> to vector<32x512xbf16>
    %cst_38 = arith.constant dense<0.000000e+00> : vector<32x512xf32>
    %67 = tpu.matmul %65, %66, %cst_38 {dimension_numbers = #tpu.dot_dimension_numbers<[1], [0], [0], [1], [0, 0, 1, 1], [], []>} : vector<32x32xbf16>, vector<32x512xbf16>, vector<32x512xf32> -> vector<32x512xf32>
    %c0_39 = arith.constant 0 : index
    %c0_40 = arith.constant 0 : index
    %68 = vector.load %arg11[%c0_39, %c0_40] : memref<32x1xf32, #tpu.memory_space<vmem>>, vector<32x1xf32>
    %69 = vector.broadcast %68 : vector<32x1xf32> to vector<32x512xf32>
    %70 = arith.addf %67, %69 : vector<32x512xf32>
    %cst_41 = arith.constant 0.000000e+00 : f32
    %71 = vector.broadcast %cst_41 : f32 to vector<32x512xf32>
    %72 = arith.cmpf ogt, %70, %71 : vector<32x512xf32>
    %cst_42 = arith.constant 0.000000e+00 : f32
    %73 = vector.broadcast %cst_42 : f32 to vector<32x512xf32>
    %74 = arith.minimumf %70, %73 : vector<32x512xf32>
    %75 = math.exp %74 : vector<32x512xf32>
    %cst_43 = arith.constant 1.000000e+00 : f32
    %76 = vector.broadcast %cst_43 : f32 to vector<32x512xf32>
    %77 = arith.subf %75, %76 : vector<32x512xf32>
    %cst_44 = arith.constant 1.67326319 : f32
    %78 = vector.broadcast %cst_44 : f32 to vector<32x512xf32>
    %79 = arith.mulf %78, %77 : vector<32x512xf32>
    %80 = arith.select %72, %70, %79 : vector<32x512xi1>, vector<32x512xf32>
    %c0_45 = arith.constant 0 : index
    %c0_46 = arith.constant 0 : index
    %81 = vector.load %arg12[%c0_45, %c0_46] : memref<32x32xbf16, #tpu.memory_space<vmem>>, vector<32x32xbf16>
    %82 = arith.truncf %80 : vector<32x512xf32> to vector<32x512xbf16>
    %cst_47 = arith.constant dense<0.000000e+00> : vector<32x512xf32>
    %83 = tpu.matmul %81, %82, %cst_47 {dimension_numbers = #tpu.dot_dimension_numbers<[1], [0], [0], [1], [0, 0, 1, 1], [], []>} : vector<32x32xbf16>, vector<32x512xbf16>, vector<32x512xf32> -> vector<32x512xf32>
    %c0_48 = arith.constant 0 : index
    %c0_49 = arith.constant 0 : index
    %84 = vector.load %arg13[%c0_48, %c0_49] : memref<32x1xf32, #tpu.memory_space<vmem>>, vector<32x1xf32>
    %85 = vector.broadcast %84 : vector<32x1xf32> to vector<32x512xf32>
    %86 = arith.addf %83, %85 : vector<32x512xf32>
    %cst_50 = arith.constant 0.000000e+00 : f32
    %87 = vector.broadcast %cst_50 : f32 to vector<32x512xf32>
    %88 = arith.cmpf ogt, %86, %87 : vector<32x512xf32>
    %cst_51 = arith.constant 0.000000e+00 : f32
    %89 = vector.broadcast %cst_51 : f32 to vector<32x512xf32>
    %90 = arith.minimumf %86, %89 : vector<32x512xf32>
    %91 = math.exp %90 : vector<32x512xf32>
    %cst_52 = arith.constant 1.000000e+00 : f32
    %92 = vector.broadcast %cst_52 : f32 to vector<32x512xf32>
    %93 = arith.subf %91, %92 : vector<32x512xf32>
    %cst_53 = arith.constant 1.67326319 : f32
    %94 = vector.broadcast %cst_53 : f32 to vector<32x512xf32>
    %95 = arith.mulf %94, %93 : vector<32x512xf32>
    %96 = arith.select %88, %86, %95 : vector<32x512xi1>, vector<32x512xf32>
    %c0_54 = arith.constant 0 : index
    %c0_55 = arith.constant 0 : index
    %97 = vector.load %arg14[%c0_54, %c0_55] : memref<32x1xf32, #tpu.memory_space<vmem>>, vector<32x1xf32>
    %98 = vector.broadcast %97 : vector<32x1xf32> to vector<32x512xf32>
    %99 = arith.mulf %98, %96 : vector<32x512xf32>
    %cst_56 = arith.constant dense<0.000000e+00> : vector<512xf32>
    %100 = vector.multi_reduction <add>, %99, %cst_56 [0] : vector<32x512xf32> to vector<512xf32>
    %101 = vector.shape_cast %100 : vector<512xf32> to vector<1x512xf32>
    %c0_57 = arith.constant 0 : index
    %c0_58 = arith.constant 0 : index
    %102 = vector.load %arg15[%c0_57, %c0_58] : memref<1x1xf32, #tpu.memory_space<vmem>>, vector<1x1xf32>
    %103 = vector.broadcast %102 : vector<1x1xf32> to vector<1x512xf32>
    %104 = arith.addf %101, %103 : vector<1x512xf32>
    %105 = arith.negf %104 : vector<1x512xf32>
    %106 = math.exp %105 : vector<1x512xf32>
    %cst_59 = arith.constant 1.000000e+00 : f32
    %107 = vector.broadcast %cst_59 : f32 to vector<1x512xf32>
    %108 = arith.addf %107, %106 : vector<1x512xf32>
    %109 = arith.divf %107, %108 : vector<1x512xf32>
    %c0_60 = arith.constant 0 : index
    %c0_61 = arith.constant 0 : index
    %110 = vector.load %arg16[%c0_60, %c0_61] : memref<1x512xf32, #tpu.memory_space<vmem>>, vector<1x512xf32>
    tpu.vector_store %arg16[%c0_60, %c0_61], %109 {strides = array<i32>} : memref<1x512xf32, #tpu.memory_space<vmem>>, vector<1x512xf32>,
    return
  }
  func.func @transform_0(%arg0: i32) -> (i32, i32) {
    %c0_i32 = arith.constant 0 : i32
    %c0_i32_0 = arith.constant 0 : i32
    return %arg0, %c0_i32 : i32, i32
  }
  func.func @transform_1(%arg0: i32) -> (i32, i32) {
    %c0_i32 = arith.constant 0 : i32
    %c0_i32_0 = arith.constant 0 : i32
    %c0_i32_1 = arith.constant 0 : i32
    return %c0_i32, %c0_i32_0 : i32, i32
  }
  func.func @transform_2(%arg0: i32) -> (i32, i32) {
    %c0_i32 = arith.constant 0 : i32
    %c0_i32_0 = arith.constant 0 : i32
    %c0_i32_1 = arith.constant 0 : i32
    return %c0_i32, %c0_i32_0 : i32, i32
  }
  func.func @transform_3(%arg0: i32) -> (i32, i32) {
    %c0_i32 = arith.constant 0 : i32
    %c0_i32_0 = arith.constant 0 : i32
    %c0_i32_1 = arith.constant 0 : i32
    return %c0_i32, %c0_i32_0 : i32, i32
  }
  func.func @transform_4(%arg0: i32) -> (i32, i32) {
    %c0_i32 = arith.constant 0 : i32
    %c0_i32_0 = arith.constant 0 : i32
    %c0_i32_1 = arith.constant 0 : i32
    return %c0_i32, %c0_i32_0 : i32, i32
  }
  func.func @transform_5(%arg0: i32) -> (i32, i32) {
    %c0_i32 = arith.constant 0 : i32
    %c0_i32_0 = arith.constant 0 : i32
    %c0_i32_1 = arith.constant 0 : i32
    return %c0_i32, %c0_i32_0 : i32, i32
  }
  func.func @transform_6(%arg0: i32) -> (i32, i32) {
    %c0_i32 = arith.constant 0 : i32
    %c0_i32_0 = arith.constant 0 : i32
    %c0_i32_1 = arith.constant 0 : i32
    return %c0_i32, %c0_i32_0 : i32, i32
  }
  func.func @transform_7(%arg0: i32) -> (i32, i32) {
    %c0_i32 = arith.constant 0 : i32
    %c0_i32_0 = arith.constant 0 : i32
    %c0_i32_1 = arith.constant 0 : i32
    return %c0_i32, %c0_i32_0 : i32, i32
  }
  func.func @transform_8(%arg0: i32) -> (i32, i32) {
    %c0_i32 = arith.constant 0 : i32
    %c0_i32_0 = arith.constant 0 : i32
    %c0_i32_1 = arith.constant 0 : i32
    return %c0_i32, %c0_i32_0 : i32, i32
  }
  func.func @transform_9(%arg0: i32) -> (i32, i32) {
    %c0_i32 = arith.constant 0 : i32
    %c0_i32_0 = arith.constant 0 : i32
    %c0_i32_1 = arith.constant 0 : i32
    return %c0_i32, %c0_i32_0 : i32, i32
  }
  func.func @transform_10(%arg0: i32) -> (i32, i32) {
    %c0_i32 = arith.constant 0 : i32
    %c0_i32_0 = arith.constant 0 : i32
    %c0_i32_1 = arith.constant 0 : i32
    return %c0_i32, %c0_i32_0 : i32, i32
  }
  func.func @transform_11(%arg0: i32) -> (i32, i32) {
    %c0_i32 = arith.constant 0 : i32
    %c0_i32_0 = arith.constant 0 : i32
    %c0_i32_1 = arith.constant 0 : i32
    return %c0_i32, %c0_i32_0 : i32, i32
  }
  func.func @transform_12(%arg0: i32) -> (i32, i32) {
    %c0_i32 = arith.constant 0 : i32
    %c0_i32_0 = arith.constant 0 : i32
    %c0_i32_1 = arith.constant 0 : i32
    return %c0_i32, %c0_i32_0 : i32, i32
  }
  func.func @transform_13(%arg0: i32) -> (i32, i32) {
    %c0_i32 = arith.constant 0 : i32
    %c0_i32_0 = arith.constant 0 : i32
    %c0_i32_1 = arith.constant 0 : i32
    return %c0_i32, %c0_i32_0 : i32, i32
  }
  func.func @transform_14(%arg0: i32) -> (i32, i32) {
    %c0_i32 = arith.constant 0 : i32
    %c0_i32_0 = arith.constant 0 : i32
    %c0_i32_1 = arith.constant 0 : i32
    return %c0_i32, %c0_i32_0 : i32, i32
  }
  func.func @transform_15(%arg0: i32) -> (i32, i32) {
    %c0_i32 = arith.constant 0 : i32
    %c0_i32_0 = arith.constant 0 : i32
    return %c0_i32, %arg0 : i32, i32
  }
}

</mosaic_0001>

<bundles_post_ra>
// kernel: tpu_custom_call.1
= control target key start
LH: loop header
LB: loop body
LE: loop exit
PB: predicated region body
PF: predicated region fallthrough
CT: control target
= control target key end

     0   :  { %s4102_s0 = inlined_call_operand.vmem [shape: f32[1000,16], index: 0, kind: input, shape index: {}]   ;;  %s4103_s1 = inlined_call_operand.vmem [shape: bf16[32,16], index: 1, kind: input, shape index: {}]   ;;  %s4104_s2 = inlined_call_operand.vmem [shape: f32[32,1], index: 2, kind: input, shape index: {}]   ;;  %s4105_s3 = inlined_call_operand.vmem [shape: bf16[32,32], index: 3, kind: input, shape index: {}]   ;;  %s4106_s4 = inlined_call_operand.vmem [shape: f32[32,1], index: 4, kind: input, shape index: {}]   ;;  %s4107_s5 = inlined_call_operand.vmem [shape: bf16[32,32], index: 5, kind: input, shape index: {}]   ;;  %s4108_s6 = inlined_call_operand.vmem [shape: f32[32,1], index: 6, kind: input, shape index: {}]   ;;  %s4109_s7 = inlined_call_operand.vmem [shape: bf16[32,32], index: 7, kind: input, shape index: {}]   ;;  %s4110_s8 = inlined_call_operand.vmem [shape: f32[32,1], index: 8, kind: input, shape index: {}]   ;;  %s4111_s9 = inlined_call_operand.vmem [shape: bf16[32,32], index: 9, kind: input, shape index: {}]   ;;  %s4112_s10 = inlined_call_operand.vmem [shape: f32[32,1], index: 10, kind: input, shape index: {}]   ;;  %s4113_s11 = inlined_call_operand.vmem [shape: bf16[32,32], index: 11, kind: input, shape index: {}]   ;;  %s4114_s12 = inlined_call_operand.vmem [shape: f32[32,1], index: 12, kind: input, shape index: {}]   ;;  %s4115_s13 = inlined_call_operand.vmem [shape: f32[32,1], index: 13, kind: input, shape index: {}]   ;;  %s4116_s14 = inlined_call_operand.<no memory space> [shape: f32[1,1], index: 14, kind: input, shape index: {}]   ;;  %s4117_s15 = inlined_call_operand.hbm [shape: f32[1,1024], index: 15, kind: output, shape index: {}]  }
   0x1   :  { %4119 = sst [smem:[#allocation8_spill]] %s4102_s0  ;;  %v20_v0 = vstv %s4116_s14 }
   0x2   :  { %4120 = sst [smem:[#allocation9_spill]] %s4103_s1  ;;  %21 = vst [vmem:[#allocation2] sm:$0x1] %v20_v0 }
   0x3   :  { %22 = vsyncpa [#allocation4], 0 }
   0x4   :  { %24 = vsyncpa [#allocation4 + $0x1], 0  ;;  %s3165_s20 = smov 0   ;;  %s3167_s21 = smov 0  }
   0x5   :  { %s3169_s22 = smov 0   ;;  %s3171_s23 = smov 0  }
   0x6 LB: > { %4121 = sst [smem:[#allocation6_spill]] %s3073_s22  ;;  %s2546_s14 = sadd.s32 4294967295, %s3077_s23   ;;  %s3077_s23 = sphi %s3171_s23, %s4131_s23   ;;  %s3073_s22 = sphi %s3169_s22, %s4128_s22   ;;  %s3069_s21 = sphi %s3167_s21, %s4130_s21   ;;  %s3065_s20 = sphi %s3165_s20, %s4129_s20  }
   0x7   : > { %s2547_s24 = sadd.s32 4294967294, %s3077_s23   ;;  %s3188_s25 = sadd.s32 1, %s3077_s23  }
   0x8   : > { %s357_s26 = sadd.s32 1, %s3073_s22  ;;  %s354_s27 = ssub.s32 %s3077_s23, %s3188_s25 }
   0x9   : > { %p367_p0 = scmp.ne.s32.totalorder %s3073_s22, %s3069_s21  ;;  %p355_p1 = scmp.eq.s32.totalorder %s354_s27, 0 }
   0xa   : > { %p368_p2 = scmp.eq.s32.totalorder %s2546_s14, 1  ;;  %p373_p3 = scmp.ne.s32.totalorder %s3069_s21, %s3065_s20 }
   0xb   : > { %p374_p4 = scmp.eq.s32.totalorder %s2547_s24, 1  ;;  %p2550_p7 = scmp.ge.s32.totalorder %s3077_s23, 1 }
   0xc   : > { %s3198_s28 = scalar_select %p355_p1, %s3073_s22, %s357_s26  }
   0xd   : > { %p3200_p5 = por %p368_p2, %p367_p0  ;;  %p3204_p6 = por %p374_p4, %p373_p3 }
   0xe   : > { %4122 = sst [smem:[#allocation7_spill]] %s3198_s28  ;;  %p451_p8 = scmp.lt.s32.totalorder %s3077_s23, 3 }
  0x10   : > { %p452_p9 = pnand %p2550_p7, %p451_p8 }
  0x11   : > { %s3210_s16 = sshll.u32 (!%p452_p9), %s2546_s14, 6  ;;  %s4125_s1 = sld [smem:[#allocation9_spill]] (!%p452_p9)  ;;  %vm653_vm0 = vcmask (!%p452_p9), 130048   ;;  %v619_v2 = vld [vmem:[%s4104_s2] sm:$0xff] (!%p452_p9)  ;;  %v621_v3 = vld [vmem:[%s4104_s2 + $0x10] sm:$0xff] (!%p452_p9)  ;;  %v3079_v4 = vmov (!%p452_p9), 0  }
  0x12   : > { %455 = sbr.rel (%p452_p9) target bundleno = 1702 (0x6a6), region = 80  ;;  %p508_p10 = scmp.lt.s32.totalorder (!%p452_p9), %s3210_s16, 124  ;;  %2793 = vset.pattern.permute.xlu0 (!%p452_p9), %v3079_v4  ;;  %2794 = vset.pattern.permute.xlu1 (!%p452_p9), %v3079_v4  ;;  %v620_v5 = vld [vmem:[%s4104_s2 + $0x8] sm:$0xff] (!%p452_p9)  ;;  %v622_v6 = vld [vmem:[%s4104_s2 + $0x18] sm:$0xff] (!%p452_p9)  ;;  %v986_v19 = vld [vmem:[%s4106_s4] sm:$0xff] (!%p452_p9)  ;;  %vm1020_vm15 = vcmask (!%p452_p9), 261120  }
  0x13   : > { %625 = vperm.xlu0 (!%p452_p9), %2793, %v619_v2   ;;  %635 = vperm.xlu1 (!%p452_p9), %2794, %v621_v3   ;;  %s4126_s0 = sld [smem:[#allocation8_spill]] (!%p452_p9)  ;;  %v987_v32 = vld [vmem:[%s4106_s4 + $0x8] sm:$0xff] (!%p452_p9)  ;;  %v988_v39 = vld [vmem:[%s4106_s4 + $0x10] sm:$0xff] (!%p452_p9)  ;;  %v989_v40 = vld [vmem:[%s4106_s4 + $0x18] sm:$0xff] (!%p452_p9)  ;;  %s4060_s28 = scalar_lea.hbm (!%p452_p9), %s4117_s15, %s3210_s16 }
  0x14   : > { %v1257_v49 = vld [vmem:[%s4108_s6] sm:$0xff] (!%p452_p9)  ;;  %v1258_v50 = vld [vmem:[%s4108_s6 + $0x8] sm:$0xff] (!%p452_p9)  ;;  %v1259_v57 = vld [vmem:[%s4108_s6 + $0x10] sm:$0xff] (!%p452_p9) }
  0x15   : > { %v1260_v58 = vld [vmem:[%s4108_s6 + $0x18] sm:$0xff] (!%p452_p9) }
  0x17   : > { %v3216_v1 = vld [vmem:[%s4125_s1] sm:$0xff] (!%p452_p9)   ;;  %630 = vperm.xlu0 (!%p452_p9), %2793, %v620_v5   ;;  %640 = vperm.xlu1 (!%p452_p9), %2794, %v622_v6  }
  0x18   : > { %2712 = vmatprep.mubr.msk.bf16.mxu0 (!%p452_p9), %vm653_vm0, %v3216_v1  ;;  %2732 = vmatprep.mubr.msk.bf16.mxu1 (!%p452_p9), %vm653_vm0, %v3216_v1  ;;  %v1527_v5 = vld [vmem:[%s4110_s8] sm:$0xff] (!%p452_p9) }
  0x19   : > { %s509_s26 = scalar_select %p508_p10, %s3210_s16, 124 }
  0x1b   : > { %s2553_s17 = sshll.u32 %s509_s26, 3  ;;  %992 = vperm.xlu0 %2793, %v986_v19   ;;  %997 = vperm.xlu1 %2794, %v987_v32   ;;  %v1800_v32 = vld [vmem:[%s4112_s10 + $0x18] sm:$0xff] }
  0x1c   : > { %s3234_s24 = scalar_lea.vmem %s4126_s0, %s2553_s17  ;;  %s500_s17 = sand.u32 1, %s3069_s21  }
  0x1d   : > { %v535_v7 = vld [vmem:[%s3234_s24 + $0x80] sm:$0xff]  ;;  %v536_v8 = vld [vmem:[%s3234_s24 + $0x88] sm:$0xff]  ;;  %v537_v18 = vld [vmem:[%s3234_s24 + $0x90] sm:$0xff]  ;;  %s2551_s18 = sshll.u32 %s500_s17, 2 }
  0x1e   : > { %v567_v9 = vld [vmem:[%s3234_s24 + $0x180] sm:$0xff]  ;;  %v591_v10 = vpack.c.bf16 %v536_v8, %v535_v7  ;;  %v568_v11 = vld [vmem:[%s3234_s24 + $0x188] sm:$0xff]  ;;  %v538_v21 = vld [vmem:[%s3234_s24 + $0x98] sm:$0xff]  ;;  %s502_s19 = scalar_lea.vmem [#allocation3], %s2551_s18  ;;  %s3081_s18 = smov [#allocation3]  }
  0x1f   : > { %v519_v12 = vld [vmem:[%s3234_s24] sm:$0xff]  ;;  %v520_v13 = vld [vmem:[%s3234_s24 + $0x8] sm:$0xff]  ;;  %v607_v14 = vpack.c.bf16 %v568_v11, %v567_v9  ;;  %v569_v22 = vld [vmem:[%s3234_s24 + $0x190] sm:$0xff]  ;;  %v592_v25 = vpack.c.bf16 %v538_v21, %v537_v18  ;;  %1002 = vperm.xlu0 %2793, %v988_v39   ;;  %1007 = vperm.xlu1 %2794, %v989_v40   ;;  %s2488_s26 = sshll.u32 %s502_s19, 4  ;;  %s3019_s0 = sshll.u32 %s3081_s18, 4  ;;  %s4062_s26 = int_to_ptr.vmem [resolvable:$true] %s2488_s26  ;;  %s3020_s0 = int_to_ptr.vmem [resolvable:$false] %s3019_s0 }
  0x20   : > { %v583_v15 = vpack.c.bf16 %v520_v13, %v519_v12  ;;  %v551_v16 = vld [vmem:[%s3234_s24 + $0x100] sm:$0xff]  ;;  %v552_v17 = vld [vmem:[%s3234_s24 + $0x108] sm:$0xff]  ;;  %2736 = vmatprep.subr.msk.bf16.mxu0 %vm653_vm0, %v591_v10  ;;  %v570_v23 = vld [vmem:[%s3234_s24 + $0x198] sm:$0xff]  ;;  %s3015_s27 = scalar_lea.vmem %s4062_s26, 64  ;;  %p3022_p0 = scmp.lt.s32.totalorder %s4062_s26, %s3020_s0 }
  0x21   : > { %v599_v20 = vpack.c.bf16 %v552_v17, %v551_v16  ;;  %2744 = vmatprep.subr.msk.bf16.mxu1 %vm653_vm0, %v607_v14  ;;  %v608_v26 = vpack.c.bf16 %v570_v23, %v569_v22  ;;  %v521_v27 = vld [vmem:[%s3234_s24 + $0x10] sm:$0xff]  ;;  %v522_v28 = vld [vmem:[%s3234_s24 + $0x18] sm:$0xff]  ;;  %v539_v35 = vld [vmem:[%s3234_s24 + $0xa0] sm:$0xff]  ;;  %p3016_p11 = scmp.ne.s32.totalorder %s4062_s26, %s3015_s27 }
  0x22   : > { %v661_v24 = vsel %vm653_vm0, %v583_v15, 0  ;;  %v553_v29 = vld [vmem:[%s3234_s24 + $0x110] sm:$0xff]  ;;  %v554_v31 = vld [vmem:[%s3234_s24 + $0x118] sm:$0xff]  ;;  %v584_v33 = vpack.c.bf16 %v522_v28, %v521_v27  ;;  %v540_v36 = vld [vmem:[%s3234_s24 + $0xa8] sm:$0xff] }
  0x23   : > { %2697 = vmatpush3.bf16.xpose.msra.mxu0 %v661_v24  ;;  %v709_v30 = vsel %vm653_vm0, %v599_v20, 0  ;;  %v600_v34 = vpack.c.bf16 %v554_v31, %v553_v29  ;;  %v571_v37 = vld [vmem:[%s3234_s24 + $0x1a0] sm:$0xff]  ;;  %v572_v38 = vld [vmem:[%s3234_s24 + $0x1a8] sm:$0xff]  ;;  %v593_v42 = vpack.c.bf16 %v540_v36, %v539_v35  ;;  %v541_v53 = vld [vmem:[%s3234_s24 + $0xb0] sm:$0xff]  ;;  %1263 = vperm.xlu0 %2793, %v1257_v49   ;;  %p3017_p12 = pnand %p3016_p11, %p3200_p5 }
  0x24   : > { %2717 = vmatpush3.bf16.xpose.msra.mxu1 %v709_v30  ;;  %2737 = vmatprep.subr.msk.bf16.mxu0 %vm653_vm0, %v592_v25  ;;  %v664_v41 = vsel %vm653_vm0, %v584_v33, 0  ;;  %v609_v44 = vpack.c.bf16 %v572_v38, %v571_v37  ;;  %v523_v45 = vld [vmem:[%s3234_s24 + $0x20] sm:$0xff]  ;;  %v524_v46 = vld [vmem:[%s3234_s24 + $0x28] sm:$0xff]  ;;  %v542_v54 = vld [vmem:[%s3234_s24 + $0xb8] sm:$0xff] }
  0x25   : > { %2745 = vmatprep.subr.msk.bf16.mxu1 %vm653_vm0, %v608_v26  ;;  %v712_v43 = vsel %vm653_vm0, %v600_v34, 0  ;;  %v555_v47 = vld [vmem:[%s3234_s24 + $0x120] sm:$0xff]  ;;  %v556_v48 = vld [vmem:[%s3234_s24 + $0x128] sm:$0xff]  ;;  %v585_v51 = vpack.c.bf16 %v524_v46, %v523_v45  ;;  %v573_v55 = vld [vmem:[%s3234_s24 + $0x1b0] sm:$0xff]  ;;  %1268 = vperm.xlu1 %2794, %v1258_v50   ;;  %v594_v60 = vpack.c.bf16 %v542_v54, %v541_v53  ;;  %p3018_p13 = pneg %p3017_p12 }
  0x26   : > { %v601_v52 = vpack.c.bf16 %v556_v48, %v555_v47  ;;  %v574_v56 = vld [vmem:[%s3234_s24 + $0x1b8] sm:$0xff]  ;;  %v525_v61 = vld [vmem:[%s3234_s24 + $0x30] sm:$0xff]  ;;  %v1528_v7 = vld [vmem:[%s4110_s8 + $0x8] sm:$0xff] }
  0x27   : > { %v667_v59 = vsel %vm653_vm0, %v585_v51, 0  ;;  %v526_v62 = vld [vmem:[%s3234_s24 + $0x38] sm:$0xff]  ;;  %v610_v0 = vpack.c.bf16 %v574_v56, %v573_v55  ;;  %v557_v2 = vld [vmem:[%s3234_s24 + $0x130] sm:$0xff]  ;;  %1273 = vperm.xlu0 %2793, %v1259_v57   ;;  %v543_v9 = vld [vmem:[%s3234_s24 + $0xc0] sm:$0xff] }
  0x28   : > { %v715_v63 = vsel %vm653_vm0, %v601_v52, 0  ;;  %v558_v3 = vld [vmem:[%s3234_s24 + $0x138] sm:$0xff]  ;;  %v586_v6 = vpack.c.bf16 %v526_v62, %v525_v61  ;;  %v544_v10 = vld [vmem:[%s3234_s24 + $0xc8] sm:$0xff]  ;;  %v575_v11 = vld [vmem:[%s3234_s24 + $0x1c0] sm:$0xff] }
  0x29   : > { %1278 = vperm.xlu1 %2794, %v1260_v58   ;;  %v602_v8 = vpack.c.bf16 %v558_v3, %v557_v2  ;;  %v576_v12 = vld [vmem:[%s3234_s24 + $0x1c8] sm:$0xff]  ;;  %v1529_v13 = vld [vmem:[%s4110_s8 + $0x10] sm:$0xff]  ;;  %v527_v15 = vld [vmem:[%s3234_s24 + $0x40] sm:$0xff]  ;;  %v595_v19 = vpack.c.bf16 %v544_v10, %v543_v9 }
  0x2a   : > { %v670_v14 = vsel %vm653_vm0, %v586_v6, 0  ;;  %v528_v16 = vld [vmem:[%s3234_s24 + $0x48] sm:$0xff]  ;;  %v1530_v17 = vld [vmem:[%s4110_s8 + $0x18] sm:$0xff]  ;;  %v559_v20 = vld [vmem:[%s3234_s24 + $0x140] sm:$0xff]  ;;  %v611_v23 = vpack.c.bf16 %v576_v12, %v575_v11 }
  0x2b   : > { %2699 = vmatpush3.bf16.xpose.msra.mxu0 %v664_v41  ;;  %1533 = vperm.xlu0 %2793, %v1527_v5   ;;  %v718_v18 = vsel %vm653_vm0, %v602_v8, 0  ;;  %v560_v21 = vld [vmem:[%s3234_s24 + $0x148] sm:$0xff]  ;;  %v1797_v22 = vld [vmem:[%s4112_s10] sm:$0xff]  ;;  %v545_v25 = vld [vmem:[%s3234_s24 + $0xd0] sm:$0xff]  ;;  %v587_v27 = vpack.c.bf16 %v528_v16, %v527_v15 }
  0x2c   : > { %2719 = vmatpush3.bf16.xpose.msra.mxu1 %v712_v43  ;;  %2738 = vmatprep.subr.msk.bf16.mxu0 %vm653_vm0, %v593_v42  ;;  %v1798_v24 = vld [vmem:[%s4112_s10 + $0x8] sm:$0xff]  ;;  %v546_v26 = vld [vmem:[%s3234_s24 + $0xd8] sm:$0xff]  ;;  %v577_v28 = vld [vmem:[%s3234_s24 + $0x1d0] sm:$0xff]  ;;  %v603_v31 = vpack.c.bf16 %v560_v21, %v559_v20 }
  0x2d   : > { %2746 = vmatprep.subr.msk.bf16.mxu1 %vm653_vm0, %v609_v44  ;;  %1538 = vperm.xlu1 %2794, %v1528_v7   ;;  %v578_v29 = vld [vmem:[%s3234_s24 + $0x1d8] sm:$0xff]  ;;  %v1799_v30 = vld [vmem:[%s4112_s10 + $0x10] sm:$0xff]  ;;  %v673_v33 = vsel %vm653_vm0, %v587_v27, 0  ;;  %v596_v34 = vpack.c.bf16 %v546_v26, %v545_v25  ;;  %v2067_v41 = vld [vmem:[%s4114_s12] sm:$0xff] }
  0x2e   : > { %v721_v35 = vsel %vm653_vm0, %v603_v31, 0  ;;  %v612_v36 = vpack.c.bf16 %v578_v29, %v577_v28  ;;  %v529_v37 = vld [vmem:[%s3234_s24 + $0x50] sm:$0xff]  ;;  %v530_v38 = vld [vmem:[%s3234_s24 + $0x58] sm:$0xff]  ;;  %v2068_v42 = vld [vmem:[%s4114_s12 + $0x8] sm:$0xff] }
  0x2f   : > { %1543 = vperm.xlu0 %2793, %v1529_v13   ;;  %v561_v39 = vld [vmem:[%s3234_s24 + $0x150] sm:$0xff]  ;;  %v562_v40 = vld [vmem:[%s3234_s24 + $0x158] sm:$0xff]  ;;  %v588_v43 = vpack.c.bf16 %v530_v38, %v529_v37  ;;  %v547_v45 = vld [vmem:[%s3234_s24 + $0xe0] sm:$0xff] }
  0x30   : > { %v604_v44 = vpack.c.bf16 %v562_v40, %v561_v39  ;;  %v548_v46 = vld [vmem:[%s3234_s24 + $0xe8] sm:$0xff]  ;;  %v579_v47 = vld [vmem:[%s3234_s24 + $0x1e0] sm:$0xff]  ;;  %v2069_v49 = vld [vmem:[%s4114_s12 + $0x10] sm:$0xff] }
  0x31   : > { %1548 = vperm.xlu1 %2794, %v1530_v17   ;;  %v580_v48 = vld [vmem:[%s3234_s24 + $0x1e8] sm:$0xff]  ;;  %v2070_v50 = vld [vmem:[%s4114_s12 + $0x18] sm:$0xff]  ;;  %v676_v51 = vsel %vm653_vm0, %v588_v43, 0  ;;  %v597_v52 = vpack.c.bf16 %v548_v46, %v547_v45  ;;  %v531_v55 = vld [vmem:[%s3234_s24 + $0x60] sm:$0xff] }
  0x32   : > { %v724_v53 = vsel %vm653_vm0, %v604_v44, 0  ;;  %v613_v54 = vpack.c.bf16 %v580_v48, %v579_v47  ;;  %v532_v56 = vld [vmem:[%s3234_s24 + $0x68] sm:$0xff]  ;;  %v563_v57 = vld [vmem:[%s3234_s24 + $0x160] sm:$0xff]  ;;  %v581_v2 = vld [vmem:[%s3234_s24 + $0x1f0] sm:$0xff] }
  0x33   : > { %2701 = vmatpush3.bf16.xpose.msra.mxu0 %v667_v59  ;;  %1803 = vperm.xlu0 %2793, %v1797_v22   ;;  %v564_v58 = vld [vmem:[%s3234_s24 + $0x168] sm:$0xff]  ;;  %v2325_v59 = vld [vmem:[%s4115_s13] sm:$0xff]  ;;  %v589_v61 = vpack.c.bf16 %v532_v56, %v531_v55  ;;  %v582_v3 = vld [vmem:[%s3234_s24 + $0x1f8] sm:$0xff] }
  0x34   : > { %2721 = vmatpush3.bf16.xpose.msra.mxu1 %v715_v63  ;;  %2739 = vmatprep.subr.msk.bf16.mxu0 %vm653_vm0, %v594_v60  ;;  %v2326_v60 = vld [vmem:[%s4115_s13 + $0x8] sm:$0xff]  ;;  %v605_v62 = vpack.c.bf16 %v564_v58, %v563_v57  ;;  %v549_v63 = vld [vmem:[%s3234_s24 + $0xf0] sm:$0xff]  ;;  %v2328_v6 = vld [vmem:[%s4115_s13 + $0x18] sm:$0xff]  ;;  %v614_v10 = vpack.c.bf16 %v582_v3, %v581_v2 }
  0x35   : > { %2747 = vmatprep.subr.msk.bf16.mxu1 %vm653_vm0, %v610_v0  ;;  %1808 = vperm.xlu1 %2794, %v1798_v24   ;;  %v550_v0 = vld [vmem:[%s3234_s24 + $0xf8] sm:$0xff]  ;;  %v2327_v5 = vld [vmem:[%s4115_s13 + $0x10] sm:$0xff]  ;;  %v679_v7 = vsel %vm653_vm0, %v589_v61, 0  ;;  %v2401_v15 = vld [vmem:[#allocation2] sm:$0x1] }
  0x36   : > { %v598_v8 = vpack.c.bf16 %v550_v0, %v549_v63  ;;  %v727_v9 = vsel %vm653_vm0, %v605_v62, 0  ;;  %v533_v11 = vld [vmem:[%s3234_s24 + $0x70] sm:$0xff]  ;;  %v534_v12 = vld [vmem:[%s3234_s24 + $0x78] sm:$0xff]  ;;  %v2796_v20 = vld [vmem:[%s4125_s1 + $0x8] sm:$0xff]   ;;  %s3021_s1 = scalar_lea.vmem %s3020_s0, 128 }
  0x37   : > { %1813 = vperm.xlu0 %2793, %v1799_v30   ;;  %v565_v13 = vld [vmem:[%s3234_s24 + $0x170] sm:$0xff]  ;;  %v590_v16 = vpack.c.bf16 %v534_v12, %v533_v11  ;;  %p3023_p1 = scmp.lt.s32.totalorder %s3021_s1, %s3015_s27 }
  0x39   : > { %1818 = vperm.xlu1 %2794, %v1800_v32   ;;  %p3024_p2 = por %p3023_p1, %p3022_p0 }
  0x3b   : > { %2703 = vmatpush3.bf16.xpose.msra.mxu0 %v670_v14  ;;  %2073 = vperm.xlu0 %2793, %v2067_v41   ;;  %v566_v14 = vld [vmem:[%s3234_s24 + $0x178] sm:$0xff]  ;;  %s2474_s24 = scalar_lea.sflag [#allocation4], %s500_s17  ;;  %p3025_p3 = pnand %p3024_p2, %p3018_p13 }
  0x3c   : > { %2723 = vmatpush3.bf16.xpose.msra.mxu1 %v718_v18  ;;  %2740 = vmatprep.subr.msk.bf16.mxu0 %vm653_vm0, %v595_v19  ;;  %v606_v17 = vpack.c.bf16 %v566_v14, %v565_v13  ;;  %v682_v18 = vsel %vm653_vm0, %v590_v16, 0 }
  0x3d   : > { %2748 = vmatprep.subr.msk.bf16.mxu1 %vm653_vm0, %v611_v23  ;;  %2078 = vperm.xlu1 %2794, %v2068_v42  }
  0x3e   : > { %v730_v19 = vsel %vm653_vm0, %v606_v17, 0 }
  0x3f   : > { %2083 = vperm.xlu0 %2793, %v2069_v49  }
  0x41   : > { %2088 = vperm.xlu1 %2794, %v2070_v50  }
  0x43   : > { %2705 = vmatpush3.bf16.xpose.msra.mxu0 %v673_v33  ;;  %2331 = vperm.xlu0 %2793, %v2325_v59  }
  0x44   : > { %2725 = vmatpush3.bf16.xpose.msra.mxu1 %v721_v35  ;;  %2741 = vmatprep.subr.msk.bf16.mxu0 %vm653_vm0, %v596_v34 }
  0x45   : > { %2749 = vmatprep.subr.msk.bf16.mxu1 %vm653_vm0, %v612_v36  ;;  %2336 = vperm.xlu1 %2794, %v2326_v60  }
  0x47   : > { %2341 = vperm.xlu0 %2793, %v2327_v5  }
  0x49   : > { %2346 = vperm.xlu1 %2794, %v2328_v6  }
  0x4b   : > { %2707 = vmatpush3.bf16.xpose.msra.mxu0 %v676_v51  ;;  %2404 = vperm.xlu0 %2793, %v2401_v15  }
  0x4c   : > { %2727 = vmatpush3.bf16.xpose.msra.mxu1 %v724_v53  ;;  %2742 = vmatprep.subr.msk.bf16.mxu0 %vm653_vm0, %v597_v52 }
  0x4d   : > { %2750 = vmatprep.subr.msk.bf16.mxu1 %vm653_vm0, %v613_v54 }
  0x53   : > { %2709 = vmatpush3.bf16.xpose.msra.mxu0 %v679_v7 }
  0x54   : > { %2729 = vmatpush3.bf16.xpose.msra.mxu1 %v727_v9  ;;  %2743 = vmatprep.subr.msk.bf16.mxu0 %vm653_vm0, %v598_v8 }
  0x55   : > { %2751 = vmatprep.subr.msk.bf16.mxu1 %vm653_vm0, %v614_v10 }
  0x5b   : > { %2711 = vmatpush3.bf16.xpose.msra.mxu0 %v682_v18 }
  0x5c   : > { %2731 = vmatpush3.bf16.xpose.msra.mxu1 %v730_v19 }
  0x62   : > { %2713 = vmatmul.mubr.msk.bf16.vlgmr.msra.gmra.mrb[0].mxu0 %vm653_vm0, %v3216_v1 }
  0x63   : > { %2733 = vmatmul.mubr.msk.bf16.vlgmr.msra.gmra.mrb[0].mxu1 %vm653_vm0, %v3216_v1  ;;  %2714 = vmatprep.mubr.msk.bf16.mxu0 %vm653_vm0, %v2796_v20 }
  0x64   : > { %2734 = vmatprep.mubr.msk.bf16.mxu1 %vm653_vm0, %v2796_v20 }
  0x6a   : > { %2715 = vmatmul.mubr.msk.bf16.gmra.mrb[4].mxu0 %vm653_vm0, %v2796_v20 }
  0x6b   : > { %2735 = vmatmul.mubr.msk.bf16.gmra.mrb[4].mxu1 %vm653_vm0, %v2796_v20  ;;  %1059 = vmatprep.mubr.bf16.mxu0 %v3079_v4 }
  0x6c   : > { %1112 = vmatprep.mubr.bf16.mxu1 %v3079_v4 }
  0x92   : > { %v626_v21 = vpop.permute.xlu0 %625  ;;  %v636_v47 = vpop.permute.xlu1 %635 }
  0x96   : > { %v631_v22 = vpop.permute.xlu0 %630  ;;  %v641_v6 = vpop.permute.xlu1 %640 }
 0x135   : > { %v790_v23 = vpop.f32.mrb[0].mxu0 }
 0x136   : > { %v3423_v24 = vadd.f32 %v790_v23, %v626_v21  ;;  %v843_v25 = vpop.f32.mrb[0].mxu1  ;;  %v792_v26 = vpop.f32.mrb[1].mxu0 }
 0x137   : > { %v3425_v1 = vadd.f32 %v843_v25, %v626_v21  ;;  %v3427_v27 = vadd.f32 %v792_v26, %v626_v21  ;;  %v845_v28 = vpop.f32.mrb[1].mxu1  ;;  %v794_v29 = vpop.f32.mrb[2].mxu0 }
 0x138   : > { %v878_v30 = vmin.f32 %v3423_v24, 0.0  ;;  %v3430_v31 = vadd.f32 %v845_v28, %v626_v21  ;;  %v3432_v32 = vadd.f32 %v794_v29, %v631_v22  ;;  %v847_v33 = vpop.f32.mrb[2].mxu1  ;;  %v796_v34 = vpop.f32.mrb[3].mxu0  ;;  %vm862_vm1 = vcmp.gt.f32.partialorder %v3423_v24, 0.0 }
 0x139   : > { %v880_v35 = vmin.f32 %v3425_v1, 0.0  ;;  %v879_v36 = vmin.f32 %v3427_v27, 0.0  ;;  %v849_v37 = vpop.f32.mrb[3].mxu1  ;;  %v3438_v43 = vadd.f32 %v847_v33, %v631_v22  ;;  %v3440_v45 = vadd.f32 %v796_v34, %v631_v22 }
 0x13a   : > { %v894_v38 = vmul.f32 1.442695, %v878_v30  ;;  %v881_v39 = vmin.f32 %v3430_v31, 0.0  ;;  %v882_v42 = vmin.f32 %v3432_v32, 0.0  ;;  %v3442_v46 = vadd.f32 %v849_v37, %v631_v22 }
 0x13b   : > { %v898_v40 = vmul.f32 1.442695, %v880_v35  ;;  %v896_v41 = vmul.f32 1.442695, %v879_v36  ;;  %v884_v49 = vmin.f32 %v3438_v43, 0.0  ;;  %v883_v51 = vmin.f32 %v3440_v45, 0.0 }
 0x13c   : > { %2807 = vpow2.f32 %v894_v38  ;;  %v900_v44 = vmul.f32 1.442695, %v881_v39  ;;  %v902_v48 = vmul.f32 1.442695, %v882_v42  ;;  %v885_v55 = vmin.f32 %v3442_v46, 0.0 }
 0x13d   : > { %2809 = vpow2.f32 %v898_v40  ;;  %v800_v50 = vpop.f32.mrb[4].mxu0  ;;  %v906_v54 = vmul.f32 1.442695, %v884_v49  ;;  %v904_v59 = vmul.f32 1.442695, %v883_v51  ;;  %vm864_vm2 = vcmp.gt.f32.partialorder %v3425_v1, 0.0 }
 0x13e   : > { %2811 = vpow2.f32 %v896_v41  ;;  %v853_v52 = vpop.f32.mrb[4].mxu1  ;;  %v802_v53 = vpop.f32.mrb[5].mxu0  ;;  %v3447_v56 = vadd.f32 %v800_v50, %v636_v47  ;;  %v908_v0 = vmul.f32 1.442695, %v885_v55  ;;  %vm863_vm3 = vcmp.gt.f32.partialorder %v3427_v27, 0.0 }
 0x13f   : > { %2813 = vpow2.f32 %v900_v44  ;;  %v855_v57 = vpop.f32.mrb[5].mxu1  ;;  %v804_v58 = vpop.f32.mrb[6].mxu0  ;;  %v3449_v60 = vadd.f32 %v853_v52, %v636_v47  ;;  %v3451_v61 = vadd.f32 %v802_v53, %v636_v47  ;;  %vm866_vm4 = vcmp.gt.f32.partialorder %v3432_v32, 0.0 }
 0x140   : > { %2815 = vpow2.f32 %v902_v48  ;;  %v857_v62 = vpop.f32.mrb[6].mxu1  ;;  %v806_v63 = vpop.f32.mrb[7].mxu0  ;;  %v886_v2 = vmin.f32 %v3447_v56, 0.0  ;;  %v3456_v9 = vadd.f32 %v855_v57, %v636_v47  ;;  %v3458_v11 = vadd.f32 %v804_v58, %v641_v6 }
 0x141   : > { %2817 = vpow2.f32 %v906_v54  ;;  %v859_v3 = vpop.f32.mrb[7].mxu1  ;;  %v888_v5 = vmin.f32 %v3449_v60, 0.0  ;;  %v887_v8 = vmin.f32 %v3451_v61, 0.0  ;;  %v3460_v12 = vadd.f32 %v857_v62, %v641_v6 }
 0x142   : > { %2819 = vpow2.f32 %v904_v59  ;;  %v910_v7 = vmul.f32 1.442695, %v886_v2  ;;  %v3462_v13 = vadd.f32 %v806_v63, %v641_v6  ;;  %v889_v15 = vmin.f32 %v3456_v9, 0.0 }
 0x143   : > { %2821 = vpow2.f32 %v908_v0  ;;  %v914_v10 = vmul.f32 1.442695, %v888_v5  ;;  %v912_v14 = vmul.f32 1.442695, %v887_v8  ;;  %v890_v17 = vmin.f32 %v3458_v11, 0.0 }
 0x144   : > { %2823 = vpow2.f32 %v910_v7  ;;  %v892_v20 = vmin.f32 %v3460_v12, 0.0  ;;  %v891_v25 = vmin.f32 %v3462_v13, 0.0  ;;  %vm865_vm5 = vcmp.gt.f32.partialorder %v3430_v31, 0.0 }
 0x145   : > { %2825 = vpow2.f32 %v914_v10  ;;  %v918_v23 = vmul.f32 1.442695, %v890_v17  ;;  %vm868_vm6 = vcmp.gt.f32.partialorder %v3438_v43, 0.0  ;;  %v916_v29 = vmul.f32 1.442695, %v889_v15 }
 0x146   : > { %v2808_v16 = vpop.eup %2807  ;;  %2827 = vpow2.f32 %v912_v14  ;;  %v922_v30 = vmul.f32 1.442695, %v892_v20  ;;  %v920_v36 = vmul.f32 1.442695, %v891_v25  ;;  %vm867_vm7 = vcmp.gt.f32.partialorder %v3440_v45, 0.0 }
 0x147   : > { %v2810_v18 = vpop.eup %2809  ;;  %v2560_v19 = vadd.f32 -1.0, %v2808_v16  ;;  %2829 = vpow2.f32 %v918_v23  ;;  %vm869_vm8 = vcmp.gt.f32.partialorder %v3442_v46, 0.0  ;;  %v3476_v49 = vadd.f32 %v859_v3, %v641_v6 }
 0x148   : > { %v2812_v21 = vpop.eup %2811  ;;  %v2562_v22 = vadd.f32 -1.0, %v2810_v18  ;;  %2831 = vpow2.f32 %v922_v30  ;;  %vm870_vm9 = vcmp.gt.f32.partialorder %v3447_v56, 0.0  ;;  %vm872_vm10 = vcmp.gt.f32.partialorder %v3449_v60, 0.0 }
 0x149   : > { %v2814_v26 = vpop.eup %2813  ;;  %v2561_v28 = vadd.f32 -1.0, %v2812_v21  ;;  %v942_v34 = vmul.f32 1.6732632, %v2560_v19  ;;  %2833 = vpow2.f32 %v920_v36  ;;  %v893_v59 = vmin.f32 %v3476_v49, 0.0 }
 0x14a   : > { %v2816_v33 = vpop.eup %2815  ;;  %v2563_v35 = vadd.f32 -1.0, %v2814_v26  ;;  %v944_v38 = vmul.f32 1.6732632, %v2562_v22  ;;  %2835 = vpow2.f32 %v916_v29  ;;  %vm871_vm11 = vcmp.gt.f32.partialorder %v3451_v61, 0.0 }
 0x14b   : > { %v2818_v37 = vpop.eup %2817  ;;  %v2564_v39 = vadd.f32 -1.0, %v2816_v33  ;;  %v943_v41 = vmul.f32 1.6732632, %v2561_v28  ;;  %v958_v50 = vsel %vm862_vm1, %v3423_v24, %v942_v34  ;;  %v924_v6 = vmul.f32 1.442695, %v893_v59 }
 0x14c   : > { %v2820_v40 = vpop.eup %2819  ;;  %v2566_v42 = vadd.f32 -1.0, %v2818_v37  ;;  %v945_v51 = vmul.f32 1.6732632, %v2563_v35  ;;  %v960_v55 = vsel %vm864_vm2, %v3425_v1, %v944_v38  ;;  %vm874_vm12 = vcmp.gt.f32.partialorder %v3458_v11, 0.0 }
 0x14d   : > { %v2822_v44 = vpop.eup %2821  ;;  %v946_v47 = vmul.f32 1.6732632, %v2564_v39  ;;  %v2565_v48 = vadd.f32 -1.0, %v2820_v40  ;;  %v959_v2 = vsel %vm863_vm3, %v3427_v27, %v943_v41  ;;  %2837 = vpow2.f32 %v924_v6  ;;  %v2798_v41 = vld [vmem:[%s4105_s3 + $0x8] sm:$0xff]  }
 0x14e   : > { %v948_v52 = vmul.f32 1.6732632, %v2566_v42  ;;  %v2567_v53 = vadd.f32 -1.0, %v2822_v44  ;;  %v2824_v54 = vpop.eup %2823  ;;  %v961_v10 = vsel %vm865_vm5, %v3430_v31, %v945_v51  ;;  %vm876_vm13 = vcmp.gt.f32.partialorder %v3460_v12, 0.0 }
 0x14f   : > { %v962_v57 = vsel %vm866_vm4, %v3432_v32, %v946_v47  ;;  %v947_v58 = vmul.f32 1.6732632, %v2565_v48  ;;  %v2826_v62 = vpop.eup %2825  ;;  %v2568_v5 = vadd.f32 -1.0, %v2824_v54  ;;  %vm875_vm14 = vcmp.gt.f32.partialorder %v3462_v13, 0.0  ;;  %v998_v48 = vpop.permute.xlu1 %997 }
 0x150   : > { %v978_v63 = vpack.c.bf16 %v962_v57, %v958_v50  ;;  %v964_v24 = vsel %vm868_vm6, %v3438_v43, %v948_v52  ;;  %v949_v0 = vmul.f32 1.6732632, %v2567_v53  ;;  %v2828_v3 = vpop.eup %2827  ;;  %v2570_v7 = vadd.f32 -1.0, %v2826_v62 }
 0x151   : > { %v980_v1 = vpack.c.bf16 %v964_v24, %v960_v55  ;;  %v963_v32 = vsel %vm867_vm7, %v3440_v45, %v947_v58  ;;  %v2569_v14 = vadd.f32 -1.0, %v2828_v3  ;;  %v2830_v15 = vpop.eup %2829  ;;  %v950_v17 = vmul.f32 1.6732632, %v2568_v5 }
 0x152   : > { %v979_v8 = vpack.c.bf16 %v963_v32, %v959_v2  ;;  %v965_v43 = vsel %vm869_vm8, %v3442_v46, %v949_v0  ;;  %v2832_v16 = vpop.eup %2831  ;;  %v2572_v18 = vadd.f32 -1.0, %v2830_v15  ;;  %v952_v19 = vmul.f32 1.6732632, %v2570_v7 }
 0x153   : > { %v981_v27 = vpack.c.bf16 %v965_v43, %v961_v10  ;;  %v2834_v45 = vpop.eup %2833  ;;  %v2574_v20 = vadd.f32 -1.0, %v2832_v16  ;;  %v951_v46 = vmul.f32 1.6732632, %v2569_v14  ;;  %v966_v25 = vsel %vm870_vm9, %v3447_v56, %v950_v17 }
 0x154   : > { %1027 = vmatprep.subr.bf16.mxu0 %v979_v8  ;;  %v2836_v31 = vpop.eup %2835  ;;  %v954_v21 = vmul.f32 1.6732632, %v2572_v18  ;;  %v2573_v22 = vadd.f32 -1.0, %v2834_v45  ;;  %v968_v29 = vsel %vm872_vm10, %v3449_v60, %v952_v19  ;;  %vm873_vm0 = vcmp.gt.f32.partialorder %v3456_v9, 0.0 }
 0x155   : > { %1080 = vmatprep.subr.bf16.mxu1 %v981_v27  ;;  %1028 = vmatpush1.bf16.msra.mxu0 %v978_v63  ;;  %v956_v23 = vmul.f32 1.6732632, %v2574_v20  ;;  %v2571_v30 = vadd.f32 -1.0, %v2836_v31  ;;  %v967_v36 = vsel %vm871_vm11, %v3451_v61, %v951_v46  ;;  %vm877_vm1 = vcmp.gt.f32.partialorder %v3476_v49, 0.0  ;;  %v1008_v20 = vpop.permute.xlu1 %1007 }
 0x156   : > { %1081 = vmatpush1.bf16.msra.mxu1 %v980_v1  ;;  %v970_v26 = vsel %vm874_vm12, %v3458_v11, %v954_v21  ;;  %v955_v28 = vmul.f32 1.6732632, %v2573_v22  ;;  %v2797_v11 = vld [vmem:[%s4105_s3] sm:$0xff]  }
 0x157   : > { %v982_v33 = vpack.c.bf16 %v970_v26, %v966_v25  ;;  %v972_v34 = vsel %vm876_vm13, %v3460_v12, %v956_v23  ;;  %v2838_v39 = vpop.eup %2837  ;;  %v953_v40 = vmul.f32 1.6732632, %v2571_v30 }
 0x158   : > { %v984_v35 = vpack.c.bf16 %v972_v34, %v968_v29  ;;  %v971_v37 = vsel %vm875_vm14, %v3462_v13, %v955_v28  ;;  %v2575_v56 = vadd.f32 -1.0, %v2838_v39 }
 0x159   : > { %v983_v38 = vpack.c.bf16 %v971_v37, %v967_v36  ;;  %v969_v61 = vsel %vm873_vm0, %v3456_v9, %v953_v40  ;;  %v993_v9 = vpop.permute.xlu0 %992 }
 0x15a   : > { %v957_v60 = vmul.f32 1.6732632, %v2575_v56 }
 0x15b   : > { %1029 = vmatprep.subr.bf16.mxu0 %v983_v38 }
 0x15c   : > { %1030 = vmatpush1.bf16.msra.mxu0 %v982_v33  ;;  %v973_v12 = vsel %vm877_vm1, %v3476_v49, %v957_v60 }
 0x15d   : > { %v985_v13 = vpack.c.bf16 %v973_v12, %v969_v61  ;;  %v1003_v63 = vpop.permute.xlu0 %1002 }
 0x15f   : > { %2578 = vmatmul.mubr.msk.bf16.vlgmr.msra.gmra.mrb[8].mxu0 %vm1020_vm15, %v2797_v11  ;;  %1082 = vmatprep.subr.bf16.mxu1 %v985_v13 }
 0x160   : > { %1069 = vmatprep.mubr.bf16.mxu0 %v3079_v4  ;;  %1083 = vmatpush1.bf16.msra.mxu1 %v984_v35 }
 0x163   : > { %2580 = vmatmul.mubr.msk.bf16.vlgmr.msra.gmra.mrb[8].mxu1 %vm1020_vm15, %v2797_v11 }
 0x164   : > { %1122 = vmatprep.mubr.bf16.mxu1 %v3079_v4 }
 0x167   : > { %2579 = vmatmul.mubr.msk.bf16.gmra.mrb[12].mxu0 %vm1020_vm15, %v2798_v41 }
 0x168   : > { %1329 = vmatprep.mubr.bf16.mxu0 %v3079_v4 }
 0x16b   : > { %2581 = vmatmul.mubr.msk.bf16.gmra.mrb[12].mxu1 %vm1020_vm15, %v2798_v41 }
 0x16c   : > { %1382 = vmatprep.mubr.bf16.mxu1 %v3079_v4 }
 0x232   : > { %v1061_v42 = vpop.f32.mrb[8].mxu0 }
 0x233   : > { %v3533_v44 = vadd.f32 %v1061_v42, %v993_v9  ;;  %v1063_v47 = vpop.f32.mrb[9].mxu0 }
 0x234   : > { %v3535_v49 = vadd.f32 %v1063_v47, %v993_v9  ;;  %v1065_v50 = vpop.f32.mrb[10].mxu0 }
 0x235   : > { %v1149_v51 = vmin.f32 %v3533_v44, 0.0  ;;  %v3538_v52 = vadd.f32 %v1065_v50, %v998_v48  ;;  %v1067_v53 = vpop.f32.mrb[11].mxu0  ;;  %vm1133_vm2 = vcmp.gt.f32.partialorder %v3533_v44, 0.0 }
 0x236   : > { %v1150_v54 = vmin.f32 %v3535_v49, 0.0  ;;  %v3541_v55 = vadd.f32 %v1067_v53, %v998_v48  ;;  %v1114_v24 = vpop.f32.mrb[8].mxu1  ;;  %vm1134_vm3 = vcmp.gt.f32.partialorder %v3535_v49, 0.0 }
 0x237   : > { %v1165_v57 = vmul.f32 1.442695, %v1149_v51  ;;  %v1153_v58 = vmin.f32 %v3538_v52, 0.0  ;;  %v3545_v2 = vadd.f32 %v1114_v24, %v993_v9  ;;  %v1116_v3 = vpop.f32.mrb[9].mxu1  ;;  %vm1137_vm4 = vcmp.gt.f32.partialorder %v3538_v52, 0.0 }
 0x238   : > { %v1167_v59 = vmul.f32 1.442695, %v1150_v54  ;;  %v1154_v62 = vmin.f32 %v3541_v55, 0.0  ;;  %v3547_v6 = vadd.f32 %v1116_v3, %v993_v9  ;;  %v1118_v32 = vpop.f32.mrb[10].mxu1  ;;  %vm1138_vm5 = vcmp.gt.f32.partialorder %v3541_v55, 0.0 }
 0x239   : > { %2839 = vpow2.f32 %v1165_v57  ;;  %v1173_v0 = vmul.f32 1.442695, %v1153_v58  ;;  %v1151_v10 = vmin.f32 %v3545_v2, 0.0  ;;  %v3552_v43 = vadd.f32 %v1118_v32, %v998_v48  ;;  %v1120_v14 = vpop.f32.mrb[11].mxu1 }
 0x23a   : > { %2841 = vpow2.f32 %v1167_v59  ;;  %v1175_v1 = vmul.f32 1.442695, %v1154_v62  ;;  %v1071_v5 = vpop.f32.mrb[12].mxu0  ;;  %v1152_v15 = vmin.f32 %v3547_v6, 0.0  ;;  %v3555_v16 = vadd.f32 %v1120_v14, %v998_v48 }
 0x23b   : > { %2843 = vpow2.f32 %v1173_v0  ;;  %v3549_v7 = vadd.f32 %v1071_v5, %v1003_v63  ;;  %v1073_v8 = vpop.f32.mrb[13].mxu0  ;;  %v1169_v18 = vmul.f32 1.442695, %v1151_v10  ;;  %v1155_v45 = vmin.f32 %v3552_v43, 0.0 }
 0x23c   : > { %2845 = vpow2.f32 %v1175_v1  ;;  %v1075_v27 = vpop.f32.mrb[14].mxu0  ;;  %v1171_v31 = vmul.f32 1.442695, %v1152_v15  ;;  %v1156_v46 = vmin.f32 %v3555_v16, 0.0  ;;  %v3560_v21 = vadd.f32 %v1073_v8, %v1003_v63 }
 0x23d   : > { %v1077_v17 = vpop.f32.mrb[15].mxu0  ;;  %v1157_v19 = vmin.f32 %v3549_v7, 0.0  ;;  %2847 = vpow2.f32 %v1169_v18  ;;  %v1177_v22 = vmul.f32 1.442695, %v1155_v45  ;;  %v3562_v25 = vadd.f32 %v1075_v27, %v1008_v20 }
 0x23e   : > { %2849 = vpow2.f32 %v1171_v31  ;;  %v1179_v26 = vmul.f32 1.442695, %v1156_v46  ;;  %v1124_v28 = vpop.f32.mrb[12].mxu1  ;;  %v1158_v29 = vmin.f32 %v3560_v21, 0.0  ;;  %v3574_v13 = vadd.f32 %v1077_v17, %v1008_v20 }
 0x23f   : > { %v1181_v23 = vmul.f32 1.442695, %v1157_v19  ;;  %2851 = vpow2.f32 %v1177_v22  ;;  %v3565_v30 = vadd.f32 %v1124_v28, %v1003_v63  ;;  %v1126_v33 = vpop.f32.mrb[13].mxu1  ;;  %v1161_v56 = vmin.f32 %v3562_v25, 0.0 }
 0x240   : > { %2853 = vpow2.f32 %v1179_v26  ;;  %v1183_v35 = vmul.f32 1.442695, %v1158_v29  ;;  %v3568_v36 = vadd.f32 %v1126_v33, %v1003_v63  ;;  %v1128_v37 = vpop.f32.mrb[14].mxu1  ;;  %v1162_v0 = vmin.f32 %v3574_v13, 0.0 }
 0x241   : > { %2855 = vpow2.f32 %v1181_v23  ;;  %v1159_v40 = vmin.f32 %v3565_v30, 0.0  ;;  %v1130_v11 = vpop.f32.mrb[15].mxu1  ;;  %v3576_v48 = vadd.f32 %v1128_v37, %v1008_v20  ;;  %v1189_v57 = vmul.f32 1.442695, %v1161_v56 }
 0x242   : > { %v1160_v12 = vmin.f32 %v3568_v36, 0.0  ;;  %2857 = vpow2.f32 %v1183_v35  ;;  %v3585_v3 = vadd.f32 %v1130_v11, %v1008_v20  ;;  %v1191_v14 = vmul.f32 1.442695, %v1162_v0 }
 0x243   : > { %v2840_v34 = vpop.eup %2839  ;;  %v1185_v47 = vmul.f32 1.442695, %v1159_v40  ;;  %v1163_v62 = vmin.f32 %v3576_v48, 0.0  ;;  %vm1135_vm6 = vcmp.gt.f32.partialorder %v3545_v2, 0.0  ;;  %vm1136_vm7 = vcmp.gt.f32.partialorder %v3547_v6, 0.0 }
 0x244   : > { %v2842_v38 = vpop.eup %2841  ;;  %v2582_v39 = vadd.f32 -1.0, %v2840_v34  ;;  %v1187_v51 = vmul.f32 1.442695, %v1160_v12  ;;  %v1164_v27 = vmin.f32 %v3585_v3, 0.0  ;;  %vm1139_vm8 = vcmp.gt.f32.partialorder %v3552_v43, 0.0 }
 0x245   : > { %v2844_v60 = vpop.eup %2843  ;;  %v2583_v61 = vadd.f32 -1.0, %v2842_v38  ;;  %2859 = vpow2.f32 %v1185_v47  ;;  %v1193_v8 = vmul.f32 1.442695, %v1163_v62  ;;  %vm1140_vm9 = vcmp.gt.f32.partialorder %v3555_v16, 0.0 }
 0x246   : > { %v2846_v41 = vpop.eup %2845  ;;  %v1213_v9 = vmul.f32 1.6732632, %v2582_v39  ;;  %v2586_v42 = vadd.f32 -1.0, %v2844_v60  ;;  %2861 = vpow2.f32 %v1187_v51  ;;  %v1195_v46 = vmul.f32 1.442695, %v1164_v27 }
 0x247   : > { %v2587_v50 = vadd.f32 -1.0, %v2846_v41  ;;  %v1214_v53 = vmul.f32 1.6732632, %v2583_v61  ;;  %v2848_v63 = vpop.eup %2847  ;;  %2863 = vpow2.f32 %v1189_v57  ;;  %vm1141_vm10 = vcmp.gt.f32.partialorder %v3549_v7, 0.0 }
 0x248   : > { %v1217_v54 = vmul.f32 1.6732632, %v2586_v42  ;;  %v1229_v58 = vsel %vm1133_vm2, %v3533_v44, %v1213_v9  ;;  %v2850_v1 = vpop.eup %2849  ;;  %v2584_v5 = vadd.f32 -1.0, %v2848_v63  ;;  %2865 = vpow2.f32 %v1193_v8 }
 0x249   : > { %v1218_v59 = vmul.f32 1.6732632, %v2587_v50  ;;  %v2852_v10 = vpop.eup %2851  ;;  %v2585_v44 = vadd.f32 -1.0, %v2850_v1  ;;  %2867 = vpow2.f32 %v1191_v14  ;;  %vm1145_vm11 = vcmp.gt.f32.partialorder %v3562_v25, 0.0 }
 0x24a   : > { %v1233_v24 = vsel %vm1137_vm4, %v3538_v52, %v1217_v54  ;;  %v1230_v52 = vsel %vm1134_vm3, %v3535_v49, %v1214_v53  ;;  %v2854_v15 = vpop.eup %2853  ;;  %v1215_v17 = vmul.f32 1.6732632, %v2584_v5  ;;  %v2588_v18 = vadd.f32 -1.0, %v2852_v10 }
 0x24b   : > { %v1249_v32 = vpack.c.bf16 %v1233_v24, %v1229_v58  ;;  %v1234_v45 = vsel %vm1138_vm5, %v3541_v55, %v1218_v59  ;;  %v2856_v19 = vpop.eup %2855  ;;  %v1216_v20 = vmul.f32 1.6732632, %v2585_v44  ;;  %v2589_v31 = vadd.f32 -1.0, %v2854_v15 }
 0x24c   : > { %v1219_v22 = vmul.f32 1.6732632, %v2588_v18  ;;  %v1250_v23 = vpack.c.bf16 %v1234_v45, %v1230_v52  ;;  %2869 = vpow2.f32 %v1195_v46  ;;  %v2858_v26 = vpop.eup %2857  ;;  %v1231_v28 = vsel %vm1135_vm6, %v3545_v2, %v1215_v17 }
 0x24d   : > { %v1220_v49 = vmul.f32 1.6732632, %v2589_v31  ;;  %v2590_v29 = vadd.f32 -1.0, %v2856_v19  ;;  %v1232_v35 = vsel %vm1136_vm7, %v3547_v6, %v1216_v20  ;;  %v2591_v60 = vadd.f32 -1.0, %v2858_v26 }
 0x24e   : > { %v1235_v55 = vsel %vm1139_vm8, %v3552_v43, %v1219_v22  ;;  %1297 = vmatprep.subr.bf16.mxu0 %v1250_v23  ;;  %vm1143_vm12 = vcmp.gt.f32.partialorder %v3565_v30, 0.0  ;;  %vm1147_vm13 = vcmp.gt.f32.partialorder %v3576_v48, 0.0  ;;  %vm1142_vm14 = vcmp.gt.f32.partialorder %v3560_v21, 0.0 }
 0x24f   : > { %v2860_v33 = vpop.eup %2859  ;;  %v1251_v34 = vpack.c.bf16 %v1235_v55, %v1231_v28  ;;  %v1236_v37 = vsel %vm1140_vm9, %v3555_v16, %v1220_v49  ;;  %1298 = vmatpush1.bf16.msra.mxu0 %v1249_v32  ;;  %v1221_v11 = vmul.f32 1.6732632, %v2590_v29  ;;  %v1222_v42 = vmul.f32 1.6732632, %v2591_v60 }
 0x250   : > { %v2862_v38 = vpop.eup %2861  ;;  %v1252_v39 = vpack.c.bf16 %v1236_v37, %v1232_v35  ;;  %v2592_v56 = vadd.f32 -1.0, %v2860_v33  ;;  %vm1146_vm0 = vcmp.gt.f32.partialorder %v3574_v13, 0.0  ;;  %vm1144_vm1 = vcmp.gt.f32.partialorder %v3568_v36, 0.0 }
 0x251   : > { %v2864_v40 = vpop.eup %2863  ;;  %v2593_v61 = vadd.f32 -1.0, %v2862_v38  ;;  %v1237_v16 = vsel %vm1141_vm10, %v3549_v7, %v1221_v11  ;;  %v1238_v24 = vsel %vm1142_vm14, %v3560_v21, %v1222_v42  ;;  %vm1148_vm2 = vcmp.gt.f32.partialorder %v3585_v3, 0.0  ;;  %v2800_v21 = vld [vmem:[%s4107_s5 + $0x8] sm:$0xff]  }
 0x252   : > { %v2594_v2 = vadd.f32 -1.0, %v2864_v40  ;;  %1350 = vmatprep.subr.bf16.mxu1 %v1252_v39  ;;  %v2866_v43 = vpop.eup %2865  ;;  %v1223_v9 = vmul.f32 1.6732632, %v2592_v56 }
 0x253   : > { %1351 = vmatpush1.bf16.msra.mxu1 %v1251_v34  ;;  %v2868_v41 = vpop.eup %2867  ;;  %v2596_v6 = vadd.f32 -1.0, %v2866_v43  ;;  %v1224_v57 = vmul.f32 1.6732632, %v2593_v61 }
 0x254   : > { %v1225_v12 = vmul.f32 1.6732632, %v2594_v2  ;;  %v2595_v50 = vadd.f32 -1.0, %v2868_v41  ;;  %v1239_v62 = vsel %vm1143_vm12, %v3565_v30, %v1223_v9 }
 0x255   : > { %v1227_v54 = vmul.f32 1.6732632, %v2596_v6  ;;  %v1240_v5 = vsel %vm1144_vm1, %v3568_v36, %v1224_v57  ;;  %v1264_v36 = vpop.permute.xlu0 %1263 }
 0x256   : > { %v1241_v47 = vsel %vm1145_vm11, %v3562_v25, %v1225_v12  ;;  %v2870_v51 = vpop.eup %2869  ;;  %v1226_v58 = vmul.f32 1.6732632, %v2595_v50 }
 0x257   : > { %v1253_v53 = vpack.c.bf16 %v1241_v47, %v1237_v16  ;;  %v2597_v59 = vadd.f32 -1.0, %v2870_v51  ;;  %v1243_v7 = vsel %vm1147_vm13, %v3576_v48, %v1227_v54  ;;  %v2799_v48 = vld [vmem:[%s4107_s5] sm:$0xff]  }
 0x258   : > { %v1255_v25 = vpack.c.bf16 %v1243_v7, %v1239_v62  ;;  %v1242_v0 = vsel %vm1146_vm0, %v3574_v13, %v1226_v58 }
 0x259   : > { %v1228_v63 = vmul.f32 1.6732632, %v2597_v59  ;;  %v1254_v1 = vpack.c.bf16 %v1242_v0, %v1238_v24  ;;  %v1274_v39 = vpop.permute.xlu0 %1273 }
 0x25b   : > { %v1244_v30 = vsel %vm1148_vm2, %v3585_v3, %v1228_v63  ;;  %1299 = vmatprep.subr.bf16.mxu0 %v1254_v1  ;;  %v1269_v3 = vpop.permute.xlu1 %1268 }
 0x25c   : > { %v1256_v32 = vpack.c.bf16 %v1244_v30, %v1240_v5  ;;  %1300 = vmatpush1.bf16.msra.mxu0 %v1253_v53 }
 0x25e   : > { %1352 = vmatprep.subr.bf16.mxu1 %v1256_v32 }
 0x25f   : > { %1353 = vmatpush1.bf16.msra.mxu1 %v1255_v25  ;;  %2600 = vmatmul.mubr.msk.bf16.vlgmr.msra.gmra.mrb[16].mxu0 %vm1020_vm15, %v2799_v48  ;;  %v1279_v57 = vpop.permute.xlu1 %1278 }
 0x260   : > { %1339 = vmatprep.mubr.bf16.mxu0 %v3079_v4 }
 0x262   : > { %2602 = vmatmul.mubr.msk.bf16.vlgmr.msra.gmra.mrb[16].mxu1 %vm1020_vm15, %v2799_v48 }
 0x263   : > { %1392 = vmatprep.mubr.bf16.mxu1 %v3079_v4 }
 0x267   : > { %2601 = vmatmul.mubr.msk.bf16.gmra.mrb[20].mxu0 %vm1020_vm15, %v2800_v21 }
 0x268   : > { %1599 = vmatprep.mubr.bf16.mxu0 %v3079_v4 }
 0x26a   : > { %2603 = vmatmul.mubr.msk.bf16.gmra.mrb[20].mxu1 %vm1020_vm15, %v2800_v21 }
 0x26b   : > { %1652 = vmatprep.mubr.bf16.mxu1 %v3079_v4 }
 0x332   : > { %v1331_v13 = vpop.f32.mrb[16].mxu0 }
 0x333   : > { %v3631_v8 = vadd.f32 %v1331_v13, %v1264_v36  ;;  %v1333_v10 = vpop.f32.mrb[17].mxu0 }
 0x334   : > { %v3633_v14 = vadd.f32 %v1333_v10, %v1264_v36  ;;  %v1335_v27 = vpop.f32.mrb[18].mxu0 }
 0x335   : > { %v1384_v44 = vpop.f32.mrb[16].mxu1  ;;  %v1419_v52 = vmin.f32 %v3631_v8, 0.0  ;;  %v3638_v18 = vadd.f32 %v1335_v27, %v1269_v3  ;;  %v1337_v45 = vpop.f32.mrb[19].mxu0  ;;  %vm1403_vm3 = vcmp.gt.f32.partialorder %v3631_v8, 0.0 }
 0x336   : > { %v3636_v15 = vadd.f32 %v1384_v44, %v1264_v36  ;;  %v1386_v17 = vpop.f32.mrb[17].mxu1  ;;  %v1420_v19 = vmin.f32 %v3633_v14, 0.0  ;;  %v3643_v46 = vadd.f32 %v1337_v45, %v1269_v3  ;;  %vm1404_vm5 = vcmp.gt.f32.partialorder %v3633_v14, 0.0 }
 0x337   : > { %v3641_v20 = vadd.f32 %v1386_v17, %v1264_v36  ;;  %v1388_v31 = vpop.f32.mrb[18].mxu1  ;;  %v1435_v22 = vmul.f32 1.442695, %v1419_v52  ;;  %v1423_v55 = vmin.f32 %v3638_v18, 0.0  ;;  %vm1407_vm7 = vcmp.gt.f32.partialorder %v3638_v18, 0.0 }
 0x338   : > { %v1421_v23 = vmin.f32 %v3636_v15, 0.0  ;;  %v1390_v49 = vpop.f32.mrb[19].mxu1  ;;  %v1437_v26 = vmul.f32 1.442695, %v1420_v19  ;;  %v3648_v33 = vadd.f32 %v1388_v31, %v1269_v3  ;;  %v1424_v37 = vmin.f32 %v3643_v46, 0.0 }
 0x339   : > { %v1422_v28 = vmin.f32 %v3641_v20, 0.0  ;;  %2871 = vpow2.f32 %v1435_v22  ;;  %v1443_v35 = vmul.f32 1.442695, %v1423_v55  ;;  %v3652_v56 = vadd.f32 %v1390_v49, %v1269_v3 }
 0x33a   : > { %v1439_v29 = vmul.f32 1.442695, %v1421_v23  ;;  %2873 = vpow2.f32 %v1437_v26  ;;  %v1341_v38 = vpop.f32.mrb[20].mxu0  ;;  %v1425_v40 = vmin.f32 %v3648_v33, 0.0  ;;  %v1445_v60 = vmul.f32 1.442695, %v1424_v37 }
 0x33b   : > { %v1441_v34 = vmul.f32 1.442695, %v1422_v28  ;;  %v1343_v11 = vpop.f32.mrb[21].mxu0  ;;  %v3654_v2 = vadd.f32 %v1341_v38, %v1274_v39  ;;  %v1426_v9 = vmin.f32 %v3652_v56, 0.0  ;;  %vm1405_vm4 = vcmp.gt.f32.partialorder %v3636_v15, 0.0 }
 0x33c   : > { %2875 = vpow2.f32 %v1439_v29  ;;  %v3656_v61 = vadd.f32 %v1343_v11, %v1274_v39  ;;  %v1345_v12 = vpop.f32.mrb[22].mxu0  ;;  %v1447_v41 = vmul.f32 1.442695, %v1425_v40  ;;  %vm1406_vm6 = vcmp.gt.f32.partialorder %v3641_v20, 0.0 }
 0x33d   : > { %2877 = vpow2.f32 %v1441_v34  ;;  %v1394_v43 = vpop.f32.mrb[20].mxu1  ;;  %v1347_v16 = vpop.f32.mrb[23].mxu0  ;;  %v1427_v42 = vmin.f32 %v3654_v2, 0.0  ;;  %v1449_v51 = vmul.f32 1.442695, %v1426_v9  ;;  %v3666_v25 = vadd.f32 %v1345_v12, %v1279_v57 }
 0x33e   : > { %2879 = vpow2.f32 %v1443_v35  ;;  %v1396_v6 = vpop.f32.mrb[21].mxu1  ;;  %v3660_v47 = vadd.f32 %v1394_v43, %v1274_v39  ;;  %v1428_v53 = vmin.f32 %v3656_v61, 0.0  ;;  %v3676_v10 = vadd.f32 %v1347_v16, %v1279_v57 }
 0x33f   : > { %2881 = vpow2.f32 %v1445_v60  ;;  %v1398_v50 = vpop.f32.mrb[22].mxu1  ;;  %v1451_v58 = vmul.f32 1.442695, %v1427_v42  ;;  %v3664_v62 = vadd.f32 %v1396_v6, %v1274_v39  ;;  %v1431_v5 = vmin.f32 %v3666_v25, 0.0 }
 0x340   : > { %2883 = vpow2.f32 %v1447_v41  ;;  %v1400_v54 = vpop.f32.mrb[23].mxu1  ;;  %v1429_v59 = vmin.f32 %v3660_v47, 0.0  ;;  %v1453_v7 = vmul.f32 1.442695, %v1428_v53  ;;  %v3668_v63 = vadd.f32 %v1398_v50, %v1279_v57 }
 0x341   : > { %2885 = vpow2.f32 %v1449_v51  ;;  %v1430_v0 = vmin.f32 %v3664_v62, 0.0  ;;  %v1459_v3 = vmul.f32 1.442695, %v1431_v5  ;;  %v3678_v44 = vadd.f32 %v1400_v54, %v1279_v57 }
 0x342   : > { %2887 = vpow2.f32 %v1451_v58  ;;  %v1455_v24 = vmul.f32 1.442695, %v1429_v59  ;;  %v1433_v21 = vmin.f32 %v3668_v63, 0.0  ;;  %vm1408_vm8 = vcmp.gt.f32.partialorder %v3643_v46, 0.0 }
 0x343   : > { %v2872_v1 = vpop.eup %2871  ;;  %2889 = vpow2.f32 %v1453_v7  ;;  %v1457_v48 = vmul.f32 1.442695, %v1430_v0  ;;  %vm1409_vm9 = vcmp.gt.f32.partialorder %v3648_v33, 0.0  ;;  %v1432_v29 = vmin.f32 %v3676_v10, 0.0 }
 0x344   : > { %v2874_v30 = vpop.eup %2873  ;;  %v2604_v32 = vadd.f32 -1.0, %v2872_v1  ;;  %2891 = vpow2.f32 %v1455_v24  ;;  %v1463_v45 = vmul.f32 1.442695, %v1433_v21  ;;  %v1434_v38 = vmin.f32 %v3678_v44, 0.0 }
 0x345   : > { %v2605_v13 = vadd.f32 -1.0, %v2874_v30  ;;  %2893 = vpow2.f32 %v1457_v48  ;;  %v1461_v43 = vmul.f32 1.442695, %v1432_v29  ;;  %vm1410_vm10 = vcmp.gt.f32.partialorder %v3652_v56, 0.0 }
 0x346   : > { %v2876_v36 = vpop.eup %2875  ;;  %v1483_v52 = vmul.f32 1.6732632, %v2604_v32  ;;  %2895 = vpow2.f32 %v1459_v3  ;;  %vm1411_vm11 = vcmp.gt.f32.partialorder %v3654_v2, 0.0  ;;  %vm1415_vm12 = vcmp.gt.f32.partialorder %v3666_v25, 0.0 }
 0x347   : > { %v2878_v27 = vpop.eup %2877  ;;  %v2606_v17 = vadd.f32 -1.0, %v2876_v36  ;;  %2897 = vpow2.f32 %v1463_v45  ;;  %v1484_v28 = vmul.f32 1.6732632, %v2605_v13  ;;  %vm1413_vm13 = vcmp.gt.f32.partialorder %v3660_v47, 0.0 }
 0x348   : > { %v2880_v19 = vpop.eup %2879  ;;  %v2607_v31 = vadd.f32 -1.0, %v2878_v27  ;;  %v1499_v34 = vsel %vm1403_vm3, %v3631_v8, %v1483_v52  ;;  %v1465_v8 = vmul.f32 1.442695, %v1434_v38  ;;  %2899 = vpow2.f32 %v1461_v43 }
 0x349   : > { %v2882_v22 = vpop.eup %2881  ;;  %v1485_v23 = vmul.f32 1.6732632, %v2606_v17  ;;  %v2608_v49 = vadd.f32 -1.0, %v2880_v19  ;;  %v1500_v50 = vsel %vm1404_vm5, %v3633_v14, %v1484_v28  ;;  %vm1417_vm14 = vcmp.gt.f32.partialorder %v3668_v63, 0.0 }
 0x34a   : > { %v2884_v26 = vpop.eup %2883  ;;  %v2609_v55 = vadd.f32 -1.0, %v2882_v22  ;;  %v1486_v11 = vmul.f32 1.6732632, %v2607_v31  ;;  %2901 = vpow2.f32 %v1465_v8  ;;  %vm1412_vm0 = vcmp.gt.f32.partialorder %v3656_v61, 0.0 }
 0x34b   : > { %v1487_v35 = vmul.f32 1.6732632, %v2608_v49  ;;  %v2610_v37 = vadd.f32 -1.0, %v2884_v26  ;;  %v2886_v39 = vpop.eup %2885  ;;  %v1501_v40 = vsel %vm1405_vm4, %v3636_v15, %v1485_v23  ;;  %vm1416_vm1 = vcmp.gt.f32.partialorder %v3676_v10, 0.0 }
 0x34c   : > { %v1488_v60 = vmul.f32 1.6732632, %v2609_v55  ;;  %v2888_v12 = vpop.eup %2887  ;;  %v2611_v6 = vadd.f32 -1.0, %v2886_v39  ;;  %v1502_v14 = vsel %vm1406_vm6, %v3641_v20, %v1486_v11  ;;  %vm1414_vm2 = vcmp.gt.f32.partialorder %v3664_v62, 0.0 }
 0x34d   : > { %v1503_v41 = vsel %vm1407_vm7, %v3638_v18, %v1487_v35  ;;  %v1489_v9 = vmul.f32 1.6732632, %v2610_v37  ;;  %v2890_v16 = vpop.eup %2889  ;;  %v2612_v54 = vadd.f32 -1.0, %v2888_v12  ;;  %vm1418_vm3 = vcmp.gt.f32.partialorder %v3678_v44, 0.0 }
 0x34e   : > { %v1519_v42 = vpack.c.bf16 %v1503_v41, %v1499_v34  ;;  %v1504_v15 = vsel %vm1408_vm8, %v3643_v46, %v1488_v60  ;;  %v2892_v51 = vpop.eup %2891  ;;  %v1490_v18 = vmul.f32 1.6732632, %v2611_v6  ;;  %v2613_v48 = vadd.f32 -1.0, %v2890_v16  ;;  %v2801_v34 = vld [vmem:[%s4109_s7] sm:$0xff]  }
 0x34f   : > { %v1505_v53 = vsel %vm1409_vm9, %v3648_v33, %v1489_v9  ;;  %v2614_v58 = vadd.f32 -1.0, %v2892_v51  ;;  %v1520_v59 = vpack.c.bf16 %v1504_v15, %v1500_v50  ;;  %v2894_v7 = vpop.eup %2893  ;;  %v1491_v33 = vmul.f32 1.6732632, %v2612_v54 }
 0x350   : > { %v1521_v57 = vpack.c.bf16 %v1505_v53, %v1501_v40  ;;  %v1506_v46 = vsel %vm1410_vm10, %v3652_v56, %v1490_v18  ;;  %v2896_v24 = vpop.eup %2895  ;;  %v2615_v36 = vadd.f32 -1.0, %v2894_v7  ;;  %v1492_v19 = vmul.f32 1.6732632, %v2613_v48 }
 0x351   : > { %1567 = vmatprep.subr.bf16.mxu0 %v1520_v59  ;;  %v1522_v0 = vpack.c.bf16 %v1506_v46, %v1502_v14  ;;  %v2898_v1 = vpop.eup %2897  ;;  %v2616_v5 = vadd.f32 -1.0, %v2896_v24  ;;  %v1493_v30 = vmul.f32 1.6732632, %v2614_v58  ;;  %v1507_v56 = vsel %vm1411_vm11, %v3654_v2, %v1491_v33 }
 0x352   : > { %1568 = vmatpush1.bf16.msra.mxu0 %v1519_v42  ;;  %v2618_v32 = vadd.f32 -1.0, %v2898_v1  ;;  %v2900_v3 = vpop.eup %2899  ;;  %v1494_v23 = vmul.f32 1.6732632, %v2615_v36 }
 0x353   : > { %1620 = vmatprep.subr.bf16.mxu1 %v1522_v0  ;;  %v1495_v21 = vmul.f32 1.6732632, %v2616_v5  ;;  %v1509_v27 = vsel %vm1413_vm13, %v3660_v47, %v1493_v30  ;;  %v2617_v22 = vadd.f32 -1.0, %v2900_v3  ;;  %v1508_v47 = vsel %vm1412_vm0, %v3656_v61, %v1492_v19  ;;  %v2802_v61 = vld [vmem:[%s4109_s7 + $0x8] sm:$0xff]  }
 0x354   : > { %1621 = vmatpush1.bf16.msra.mxu1 %v1521_v57  ;;  %v1497_v20 = vmul.f32 1.6732632, %v2618_v32  ;;  %v2902_v45 = vpop.eup %2901  ;;  %v1510_v28 = vsel %vm1414_vm2, %v3664_v62, %v1494_v23  ;;  %v1534_v62 = vpop.permute.xlu0 %1533 }
 0x355   : > { %v1511_v13 = vsel %vm1415_vm12, %v3666_v25, %v1495_v21  ;;  %v2619_v49 = vadd.f32 -1.0, %v2902_v45  ;;  %v1496_v26 = vmul.f32 1.6732632, %v2617_v22 }
 0x356   : > { %v1523_v52 = vpack.c.bf16 %v1511_v13, %v1507_v56  ;;  %v1513_v17 = vsel %vm1417_vm14, %v3668_v63, %v1497_v20 }
 0x357   : > { %v1525_v31 = vpack.c.bf16 %v1513_v17, %v1509_v27  ;;  %v1498_v2 = vmul.f32 1.6732632, %v2619_v49  ;;  %v1512_v25 = vsel %vm1416_vm1, %v3676_v10, %v1496_v26  ;;  %v1539_v10 = vpop.permute.xlu1 %1538 }
 0x358   : > { %v1524_v63 = vpack.c.bf16 %v1512_v25, %v1508_v47  ;;  %v1544_v7 = vpop.permute.xlu0 %1543 }
 0x359   : > { %v1514_v55 = vsel %vm1418_vm3, %v3678_v44, %v1498_v2 }
 0x35a   : > { %v1526_v29 = vpack.c.bf16 %v1514_v55, %v1510_v28  ;;  %1569 = vmatprep.subr.bf16.mxu0 %v1524_v63 }
 0x35b   : > { %1570 = vmatpush1.bf16.msra.mxu0 %v1523_v52  ;;  %v1549_v19 = vpop.permute.xlu1 %1548 }
 0x35c   : > { %1622 = vmatprep.subr.bf16.mxu1 %v1526_v29 }
 0x35d   : > { %1623 = vmatpush1.bf16.msra.mxu1 %v1525_v31 }
 0x35e   : > { %2622 = vmatmul.mubr.msk.bf16.vlgmr.msra.gmra.mrb[24].mxu0 %vm1020_vm15, %v2801_v34 }
 0x35f   : > { %1609 = vmatprep.mubr.bf16.mxu0 %v3079_v4 }
 0x360   : > { %2624 = vmatmul.mubr.msk.bf16.vlgmr.msra.gmra.mrb[24].mxu1 %vm1020_vm15, %v2801_v34 }
 0x361   : > { %1662 = vmatprep.mubr.bf16.mxu1 %v3079_v4 }
 0x366   : > { %2623 = vmatmul.mubr.msk.bf16.gmra.mrb[28].mxu0 %vm1020_vm15, %v2802_v61 }
 0x367   : > { %1869 = vmatprep.mubr.bf16.mxu0 %v3079_v4 }
 0x368   : > { %2625 = vmatmul.mubr.msk.bf16.gmra.mrb[28].mxu1 %vm1020_vm15, %v2802_v61 }
 0x369   : > { %1922 = vmatprep.mubr.bf16.mxu1 %v3079_v4 }
 0x431   : > { %v1601_v44 = vpop.f32.mrb[24].mxu0 }
 0x432   : > { %v3739_v35 = vadd.f32 %v1601_v44, %v1534_v62  ;;  %v1603_v38 = vpop.f32.mrb[25].mxu0 }
 0x433   : > { %v1654_v37 = vpop.f32.mrb[24].mxu1  ;;  %v3743_v40 = vadd.f32 %v1603_v38, %v1534_v62  ;;  %v1605_v60 = vpop.f32.mrb[26].mxu0 }
 0x434   : > { %v3741_v39 = vadd.f32 %v1654_v37, %v1534_v62  ;;  %v1656_v11 = vpop.f32.mrb[25].mxu1  ;;  %v1689_v43 = vmin.f32 %v3739_v35, 0.0  ;;  %v3748_v41 = vadd.f32 %v1605_v60, %v1539_v10  ;;  %v1607_v6 = vpop.f32.mrb[27].mxu0  ;;  %vm1673_vm4 = vcmp.gt.f32.partialorder %v3739_v35, 0.0 }
 0x435   : > { %v3746_v12 = vadd.f32 %v1656_v11, %v1534_v62  ;;  %v1658_v9 = vpop.f32.mrb[26].mxu1  ;;  %v1690_v16 = vmin.f32 %v3743_v40, 0.0  ;;  %v3756_v58 = vadd.f32 %v1607_v6, %v1539_v10  ;;  %vm1674_vm6 = vcmp.gt.f32.partialorder %v3743_v40, 0.0 }
 0x436   : > { %v1691_v8 = vmin.f32 %v3741_v39, 0.0  ;;  %v1660_v42 = vpop.f32.mrb[27].mxu1  ;;  %v1705_v50 = vmul.f32 1.442695, %v1689_v43  ;;  %v1693_v18 = vmin.f32 %v3748_v41, 0.0  ;;  %v3754_v54 = vadd.f32 %v1658_v9, %v1539_v10 }
 0x437   : > { %v1692_v15 = vmin.f32 %v3746_v12, 0.0  ;;  %v1707_v53 = vmul.f32 1.442695, %v1690_v16  ;;  %v3758_v59 = vadd.f32 %v1660_v42, %v1539_v10  ;;  %v1694_v0 = vmin.f32 %v3756_v58, 0.0 }
 0x438   : > { %v1709_v51 = vmul.f32 1.442695, %v1691_v8  ;;  %2903 = vpow2.f32 %v1705_v50  ;;  %v1713_v14 = vmul.f32 1.442695, %v1693_v18  ;;  %v1695_v46 = vmin.f32 %v3754_v54, 0.0 }
 0x439   : > { %v1711_v57 = vmul.f32 1.442695, %v1692_v15  ;;  %v1611_v24 = vpop.f32.mrb[28].mxu0  ;;  %v1696_v30 = vmin.f32 %v3758_v59, 0.0  ;;  %v1715_v36 = vmul.f32 1.442695, %v1694_v0 }
 0x43a   : > { %2905 = vpow2.f32 %v1709_v51  ;;  %v1613_v33 = vpop.f32.mrb[29].mxu0  ;;  %v1717_v5 = vmul.f32 1.442695, %v1695_v46  ;;  %v3763_v32 = vadd.f32 %v1611_v24, %v1544_v7  ;;  %vm1675_vm5 = vcmp.gt.f32.partialorder %v3741_v39, 0.0 }
 0x43b   : > { %2907 = vpow2.f32 %v1707_v53  ;;  %v1664_v1 = vpop.f32.mrb[28].mxu1  ;;  %v1615_v21 = vpop.f32.mrb[30].mxu0  ;;  %v3767_v56 = vadd.f32 %v1613_v33, %v1544_v7  ;;  %v1719_v27 = vmul.f32 1.442695, %v1696_v30  ;;  %vm1677_vm7 = vcmp.gt.f32.partialorder %v3748_v41, 0.0 }
 0x43c   : > { %2909 = vpow2.f32 %v1711_v57  ;;  %v1666_v48 = vpop.f32.mrb[29].mxu1  ;;  %v3765_v20 = vadd.f32 %v1664_v1, %v1544_v7  ;;  %v1617_v3 = vpop.f32.mrb[31].mxu0  ;;  %v1697_v52 = vmin.f32 %v3763_v32, 0.0  ;;  %v3774_v26 = vadd.f32 %v1615_v21, %v1549_v19 }
 0x43d   : > { %2911 = vpow2.f32 %v1713_v14  ;;  %v1668_v13 = vpop.f32.mrb[30].mxu1  ;;  %v1698_v22 = vmin.f32 %v3767_v56, 0.0  ;;  %v3772_v23 = vadd.f32 %v1666_v48, %v1544_v7  ;;  %v3778_v47 = vadd.f32 %v1617_v3, %v1549_v19 }
 0x43e   : > { %2913 = vpow2.f32 %v1717_v5  ;;  %v1670_v17 = vpop.f32.mrb[31].mxu1  ;;  %v1699_v45 = vmin.f32 %v3765_v20, 0.0  ;;  %v1721_v31 = vmul.f32 1.442695, %v1697_v52  ;;  %v3776_v2 = vadd.f32 %v1668_v13, %v1549_v19 }
 0x43f   : > { %2915 = vpow2.f32 %v1715_v36  ;;  %v1723_v25 = vmul.f32 1.442695, %v1698_v22  ;;  %v1700_v63 = vmin.f32 %v3772_v23, 0.0  ;;  %v1701_v55 = vmin.f32 %v3774_v26, 0.0 }
 0x440   : > { %2917 = vpow2.f32 %v1719_v27  ;;  %v1725_v49 = vmul.f32 1.442695, %v1699_v45  ;;  %v1703_v61 = vmin.f32 %v3776_v2, 0.0  ;;  %v1702_v37 = vmin.f32 %v3778_v47, 0.0 }
 0x441   : > { %2919 = vpow2.f32 %v1721_v31  ;;  %v1729_v44 = vmul.f32 1.442695, %v1701_v55  ;;  %vm1676_vm8 = vcmp.gt.f32.partialorder %v3746_v12, 0.0  ;;  %vm1679_vm9 = vcmp.gt.f32.partialorder %v3754_v54, 0.0 }
 0x442   : > { %v2904_v28 = vpop.eup %2903  ;;  %2921 = vpow2.f32 %v1725_v49  ;;  %v1727_v60 = vmul.f32 1.442695, %v1700_v63  ;;  %v1733_v43 = vmul.f32 1.442695, %v1703_v61  ;;  %v1731_v16 = vmul.f32 1.442695, %v1702_v37 }
 0x443   : > { %v2626_v34 = vadd.f32 -1.0, %v2904_v28  ;;  %2923 = vpow2.f32 %v1723_v25  ;;  %vm1678_vm10 = vcmp.gt.f32.partialorder %v3756_v58, 0.0  ;;  %vm1680_vm11 = vcmp.gt.f32.partialorder %v3758_v59, 0.0 }
 0x444   : > { %v2906_v29 = vpop.eup %2905  ;;  %2925 = vpow2.f32 %v1729_v44  ;;  %v3792_v46 = vadd.f32 %v1670_v17, %v1549_v19  ;;  %vm1681_vm12 = vcmp.gt.f32.partialorder %v3763_v32, 0.0  ;;  %vm1683_vm13 = vcmp.gt.f32.partialorder %v3765_v20, 0.0 }
 0x445   : > { %v2908_v62 = vpop.eup %2907  ;;  %v2628_v10 = vadd.f32 -1.0, %v2906_v29  ;;  %v1753_v6 = vmul.f32 1.6732632, %v2626_v34  ;;  %2927 = vpow2.f32 %v1733_v43  ;;  %vm1682_vm14 = vcmp.gt.f32.partialorder %v3767_v56, 0.0 }
 0x446   : > { %v2910_v38 = vpop.eup %2909  ;;  %v2627_v11 = vadd.f32 -1.0, %v2908_v62  ;;  %2929 = vpow2.f32 %v1731_v16  ;;  %v1704_v36 = vmin.f32 %v3792_v46, 0.0  ;;  %vm1685_vm0 = vcmp.gt.f32.partialorder %v3774_v26, 0.0 }
 0x447   : > { %v2912_v9 = vpop.eup %2911  ;;  %v2629_v8 = vadd.f32 -1.0, %v2910_v38  ;;  %v1755_v50 = vmul.f32 1.6732632, %v2628_v10  ;;  %2931 = vpow2.f32 %v1727_v60  ;;  %v1769_v24 = vsel %vm1673_vm4, %v3739_v35, %v1753_v6 }
 0x448   : > { %v2914_v42 = vpop.eup %2913  ;;  %v2630_v15 = vadd.f32 -1.0, %v2912_v9  ;;  %v1754_v53 = vmul.f32 1.6732632, %v2627_v11  ;;  %v1735_v19 = vmul.f32 1.442695, %v1704_v36  ;;  %vm1687_vm1 = vcmp.gt.f32.partialorder %v3776_v2, 0.0 }
 0x449   : > { %v2916_v51 = vpop.eup %2915  ;;  %v2632_v18 = vadd.f32 -1.0, %v2914_v42  ;;  %v1756_v0 = vmul.f32 1.6732632, %v2629_v8  ;;  %v1771_v30 = vsel %vm1675_vm5, %v3741_v39, %v1755_v50  ;;  %vm1686_vm2 = vcmp.gt.f32.partialorder %v3778_v47, 0.0 }
 0x44a   : > { %v2918_v57 = vpop.eup %2917  ;;  %v1757_v7 = vmul.f32 1.6732632, %v2630_v15  ;;  %v2631_v14 = vadd.f32 -1.0, %v2916_v51  ;;  %v1770_v52 = vsel %vm1674_vm6, %v3743_v40, %v1754_v53  ;;  %2933 = vpow2.f32 %v1735_v19  ;;  %v2804_v53 = vld [vmem:[%s4111_s9 + $0x8] sm:$0xff]  }
 0x44b   : > { %v1759_v1 = vmul.f32 1.6732632, %v2632_v18  ;;  %v2633_v33 = vadd.f32 -1.0, %v2918_v57  ;;  %v2920_v5 = vpop.eup %2919  ;;  %v1772_v49 = vsel %vm1676_vm8, %v3746_v12, %v1756_v0  ;;  %vm1684_vm3 = vcmp.gt.f32.partialorder %v3772_v23, 0.0 }
 0x44c   : > { %v1773_v48 = vsel %vm1677_vm7, %v3748_v41, %v1757_v7  ;;  %v1758_v21 = vmul.f32 1.6732632, %v2631_v14  ;;  %v2922_v13 = vpop.eup %2921  ;;  %v2634_v45 = vadd.f32 -1.0, %v2920_v5  ;;  %vm1688_vm4 = vcmp.gt.f32.partialorder %v3792_v46, 0.0  ;;  %v1809_v14 = vpop.permute.xlu1 %1808 }
 0x44d   : > { %v1789_v3 = vpack.c.bf16 %v1773_v48, %v1769_v24  ;;  %v1775_v35 = vsel %vm1679_vm9, %v3754_v54, %v1759_v1  ;;  %v1760_v27 = vmul.f32 1.6732632, %v2633_v33  ;;  %v2924_v17 = vpop.eup %2923  ;;  %v2636_v31 = vadd.f32 -1.0, %v2922_v13 }
 0x44e   : > { %v1791_v39 = vpack.c.bf16 %v1775_v35, %v1771_v30  ;;  %v1774_v41 = vsel %vm1678_vm10, %v3756_v58, %v1758_v21  ;;  %v2635_v25 = vadd.f32 -1.0, %v2924_v17  ;;  %v2926_v63 = vpop.eup %2925  ;;  %v1761_v55 = vmul.f32 1.6732632, %v2634_v45 }
 0x44f   : > { %v1790_v22 = vpack.c.bf16 %v1774_v41, %v1770_v52  ;;  %v1776_v54 = vsel %vm1680_vm11, %v3758_v59, %v1760_v27  ;;  %v2928_v28 = vpop.eup %2927  ;;  %v2638_v29 = vadd.f32 -1.0, %v2926_v63  ;;  %v1763_v34 = vmul.f32 1.6732632, %v2636_v31 }
 0x450   : > { %v1792_v40 = vpack.c.bf16 %v1776_v54, %v1772_v49  ;;  %v2930_v58 = vpop.eup %2929  ;;  %v2640_v61 = vadd.f32 -1.0, %v2928_v28  ;;  %v1762_v59 = vmul.f32 1.6732632, %v2635_v25  ;;  %v1777_v37 = vsel %vm1681_vm12, %v3763_v32, %v1761_v55 }
 0x451   : > { %1837 = vmatprep.subr.bf16.mxu0 %v1790_v22  ;;  %v2932_v12 = vpop.eup %2931  ;;  %v1765_v62 = vmul.f32 1.6732632, %v2638_v29  ;;  %v2639_v10 = vadd.f32 -1.0, %v2930_v58  ;;  %v1779_v60 = vsel %vm1683_vm13, %v3765_v20, %v1763_v34 }
 0x452   : > { %1890 = vmatprep.subr.bf16.mxu1 %v1792_v40  ;;  %1838 = vmatpush1.bf16.msra.mxu0 %v1789_v3  ;;  %v1767_v44 = vmul.f32 1.6732632, %v2640_v61  ;;  %v2637_v43 = vadd.f32 -1.0, %v2932_v12  ;;  %v1778_v16 = vsel %vm1682_vm14, %v3767_v56, %v1762_v59  ;;  %v1819_v61 = vpop.permute.xlu1 %1818 }
 0x453   : > { %1891 = vmatpush1.bf16.msra.mxu1 %v1791_v39  ;;  %v1781_v38 = vsel %vm1685_vm0, %v3774_v26, %v1765_v62  ;;  %v1766_v11 = vmul.f32 1.6732632, %v2639_v10  ;;  %v2803_v26 = vld [vmem:[%s4111_s9] sm:$0xff]  }
 0x454   : > { %v1793_v9 = vpack.c.bf16 %v1781_v38, %v1777_v37  ;;  %v1783_v6 = vsel %vm1687_vm1, %v3776_v2, %v1767_v44  ;;  %v2934_v15 = vpop.eup %2933  ;;  %v1764_v51 = vmul.f32 1.6732632, %v2637_v43 }
 0x455   : > { %v1795_v8 = vpack.c.bf16 %v1783_v6, %v1779_v60  ;;  %v1782_v42 = vsel %vm1686_vm2, %v3778_v47, %v1766_v11  ;;  %v2641_v32 = vadd.f32 -1.0, %v2934_v15 }
 0x456   : > { %v1794_v50 = vpack.c.bf16 %v1782_v42, %v1778_v16  ;;  %v1780_v2 = vsel %vm1684_vm3, %v3772_v23, %v1764_v51  ;;  %v1804_v23 = vpop.permute.xlu0 %1803 }
 0x457   : > { %v1768_v20 = vmul.f32 1.6732632, %v2641_v32 }
 0x458   : > { %1839 = vmatprep.subr.bf16.mxu0 %v1794_v50 }
 0x459   : > { %1840 = vmatpush1.bf16.msra.mxu0 %v1793_v9  ;;  %v1784_v56 = vsel %vm1688_vm4, %v3792_v46, %v1768_v20 }
 0x45a   : > { %v1796_v47 = vpack.c.bf16 %v1784_v56, %v1780_v2  ;;  %v1814_v3 = vpop.permute.xlu0 %1813 }
 0x45c   : > { %2644 = vmatmul.mubr.msk.bf16.vlgmr.msra.gmra.mrb[32].mxu0 %vm1020_vm15, %v2803_v26  ;;  %1892 = vmatprep.subr.bf16.mxu1 %v1796_v47 }
 0x45d   : > { %1879 = vmatprep.mubr.bf16.mxu0 %v3079_v4  ;;  %1893 = vmatpush1.bf16.msra.mxu1 %v1795_v8 }
 0x460   : > { %2646 = vmatmul.mubr.msk.bf16.vlgmr.msra.gmra.mrb[32].mxu1 %vm1020_vm15, %v2803_v26 }
 0x461   : > { %1932 = vmatprep.mubr.bf16.mxu1 %v3079_v4 }
 0x464   : > { %2645 = vmatmul.mubr.msk.bf16.gmra.mrb[36].mxu0 %vm1020_vm15, %v2804_v53 }
 0x465   : > { %2139 = vmatprep.mubr.bf16.mxu0 %v3079_v4 }
 0x468   : > { %2647 = vmatmul.mubr.msk.bf16.gmra.mrb[36].mxu1 %vm1020_vm15, %v2804_v53 }
 0x469   : > { %2192 = vmatprep.mubr.bf16.mxu1 %v3079_v4 }
 0x52f   : > { %v1871_v18 = vpop.f32.mrb[32].mxu0 }
 0x530   : > { %v3849_v57 = vadd.f32 %v1871_v18, %v1804_v23  ;;  %v1873_v7 = vpop.f32.mrb[33].mxu0 }
 0x531   : > { %v3851_v46 = vadd.f32 %v1873_v7, %v1804_v23  ;;  %v1875_v24 = vpop.f32.mrb[34].mxu0 }
 0x532   : > { %v1959_v0 = vmin.f32 %v3849_v57, 0.0  ;;  %v3854_v1 = vadd.f32 %v1875_v24, %v1809_v14  ;;  %v1877_v33 = vpop.f32.mrb[35].mxu0  ;;  %vm1943_vm5 = vcmp.gt.f32.partialorder %v3849_v57, 0.0 }
 0x533   : > { %v1960_v5 = vmin.f32 %v3851_v46, 0.0  ;;  %v3857_v30 = vadd.f32 %v1877_v33, %v1809_v14  ;;  %v1924_v35 = vpop.f32.mrb[32].mxu1  ;;  %vm1944_vm6 = vcmp.gt.f32.partialorder %v3851_v46, 0.0 }
 0x534   : > { %v1975_v48 = vmul.f32 1.442695, %v1959_v0  ;;  %v1963_v21 = vmin.f32 %v3854_v1, 0.0  ;;  %v3861_v52 = vadd.f32 %v1924_v35, %v1804_v23  ;;  %v1926_v17 = vpop.f32.mrb[33].mxu1  ;;  %vm1947_vm7 = vcmp.gt.f32.partialorder %v3854_v1, 0.0 }
 0x535   : > { %v1977_v36 = vmul.f32 1.442695, %v1960_v5  ;;  %v1964_v13 = vmin.f32 %v3857_v30, 0.0  ;;  %v3863_v19 = vadd.f32 %v1926_v17, %v1804_v23  ;;  %v1928_v41 = vpop.f32.mrb[34].mxu1  ;;  %vm1948_vm8 = vcmp.gt.f32.partialorder %v3857_v30, 0.0 }
 0x536   : > { %2935 = vpow2.f32 %v1975_v48  ;;  %v1983_v27 = vmul.f32 1.442695, %v1963_v21  ;;  %v1961_v49 = vmin.f32 %v3861_v52, 0.0  ;;  %v3868_v54 = vadd.f32 %v1928_v41, %v1809_v14  ;;  %v1930_v25 = vpop.f32.mrb[35].mxu1 }
 0x537   : > { %2937 = vpow2.f32 %v1977_v36  ;;  %v1985_v39 = vmul.f32 1.442695, %v1964_v13  ;;  %v1881_v45 = vpop.f32.mrb[36].mxu0  ;;  %v1962_v63 = vmin.f32 %v3863_v19, 0.0  ;;  %v3871_v28 = vadd.f32 %v1930_v25, %v1809_v14 }
 0x538   : > { %2939 = vpow2.f32 %v1983_v27  ;;  %v3865_v31 = vadd.f32 %v1881_v45, %v1814_v3  ;;  %v1883_v22 = vpop.f32.mrb[37].mxu0  ;;  %v1979_v29 = vmul.f32 1.442695, %v1961_v49  ;;  %v1965_v58 = vmin.f32 %v3868_v54, 0.0 }
 0x539   : > { %2941 = vpow2.f32 %v1985_v39  ;;  %v1885_v40 = vpop.f32.mrb[38].mxu0  ;;  %v1981_v12 = vmul.f32 1.442695, %v1962_v63  ;;  %v1966_v59 = vmin.f32 %v3871_v28, 0.0  ;;  %v3876_v62 = vadd.f32 %v1883_v22, %v1814_v3 }
 0x53a   : > { %v1887_v55 = vpop.f32.mrb[39].mxu0  ;;  %v1967_v34 = vmin.f32 %v3865_v31, 0.0  ;;  %2943 = vpow2.f32 %v1979_v29  ;;  %v1987_v10 = vmul.f32 1.442695, %v1965_v58  ;;  %v3878_v37 = vadd.f32 %v1885_v40, %v1819_v61 }
 0x53b   : > { %2945 = vpow2.f32 %v1981_v12  ;;  %v1989_v38 = vmul.f32 1.442695, %v1966_v59  ;;  %v1934_v11 = vpop.f32.mrb[36].mxu1  ;;  %v1968_v60 = vmin.f32 %v3876_v62, 0.0  ;;  %v3890_v47 = vadd.f32 %v1887_v55, %v1819_v61 }
 0x53c   : > { %v1991_v44 = vmul.f32 1.442695, %v1967_v34  ;;  %2947 = vpow2.f32 %v1987_v10  ;;  %v3881_v43 = vadd.f32 %v1934_v11, %v1814_v3  ;;  %v1936_v9 = vpop.f32.mrb[37].mxu1  ;;  %v1971_v32 = vmin.f32 %v3878_v37, 0.0 }
 0x53d   : > { %2949 = vpow2.f32 %v1989_v38  ;;  %v1993_v8 = vmul.f32 1.442695, %v1968_v60  ;;  %v3884_v16 = vadd.f32 %v1936_v9, %v1814_v3  ;;  %v1938_v42 = vpop.f32.mrb[38].mxu1  ;;  %v1972_v27 = vmin.f32 %v3890_v47, 0.0 }
 0x53e   : > { %2951 = vpow2.f32 %v1991_v44  ;;  %v1969_v51 = vmin.f32 %v3881_v43, 0.0  ;;  %v1940_v26 = vpop.f32.mrb[39].mxu1  ;;  %v3892_v14 = vadd.f32 %v1938_v42, %v1819_v61  ;;  %v1999_v48 = vmul.f32 1.442695, %v1971_v32 }
 0x53f   : > { %v1970_v56 = vmin.f32 %v3884_v16, 0.0  ;;  %2953 = vpow2.f32 %v1993_v8  ;;  %v3901_v17 = vadd.f32 %v1940_v26, %v1819_v61  ;;  %v2001_v25 = vmul.f32 1.442695, %v1972_v27 }
 0x540   : > { %v2936_v6 = vpop.eup %2935  ;;  %v1995_v7 = vmul.f32 1.442695, %v1969_v51  ;;  %v1973_v13 = vmin.f32 %v3892_v14, 0.0  ;;  %vm1945_vm9 = vcmp.gt.f32.partialorder %v3861_v52, 0.0  ;;  %vm1946_vm10 = vcmp.gt.f32.partialorder %v3863_v19, 0.0 }
 0x541   : > { %v2938_v50 = vpop.eup %2937  ;;  %v2648_v15 = vadd.f32 -1.0, %v2936_v6  ;;  %v1997_v0 = vmul.f32 1.442695, %v1970_v56  ;;  %v1974_v40 = vmin.f32 %v3901_v17, 0.0  ;;  %vm1949_vm11 = vcmp.gt.f32.partialorder %v3868_v54, 0.0 }
 0x542   : > { %v2940_v20 = vpop.eup %2939  ;;  %v2649_v2 = vadd.f32 -1.0, %v2938_v50  ;;  %2955 = vpow2.f32 %v1995_v7  ;;  %v2003_v22 = vmul.f32 1.442695, %v1973_v13  ;;  %vm1950_vm12 = vcmp.gt.f32.partialorder %v3871_v28, 0.0 }
 0x543   : > { %v2942_v53 = vpop.eup %2941  ;;  %v2023_v23 = vmul.f32 1.6732632, %v2648_v15  ;;  %v2652_v18 = vadd.f32 -1.0, %v2940_v20  ;;  %2957 = vpow2.f32 %v1997_v0  ;;  %v2005_v59 = vmul.f32 1.442695, %v1974_v40 }
 0x544   : > { %v2653_v24 = vadd.f32 -1.0, %v2942_v53  ;;  %v2024_v33 = vmul.f32 1.6732632, %v2649_v2  ;;  %v2944_v3 = vpop.eup %2943  ;;  %2959 = vpow2.f32 %v1999_v48  ;;  %vm1951_vm13 = vcmp.gt.f32.partialorder %v3865_v31, 0.0 }
 0x545   : > { %v2027_v5 = vmul.f32 1.6732632, %v2652_v18  ;;  %v2039_v21 = vsel %vm1943_vm5, %v3849_v57, %v2023_v23  ;;  %v2946_v39 = vpop.eup %2945  ;;  %v2650_v45 = vadd.f32 -1.0, %v2944_v3  ;;  %2961 = vpow2.f32 %v2003_v22 }
 0x546   : > { %v2028_v36 = vmul.f32 1.6732632, %v2653_v24  ;;  %v2948_v49 = vpop.eup %2947  ;;  %v2651_v57 = vadd.f32 -1.0, %v2946_v39  ;;  %2963 = vpow2.f32 %v2001_v25  ;;  %vm1955_vm14 = vcmp.gt.f32.partialorder %v3878_v37, 0.0 }
 0x547   : > { %v2043_v35 = vsel %vm1947_vm7, %v3854_v1, %v2027_v5  ;;  %v2040_v1 = vsel %vm1944_vm6, %v3851_v46, %v2024_v33  ;;  %v2950_v63 = vpop.eup %2949  ;;  %v2025_v55 = vmul.f32 1.6732632, %v2650_v45  ;;  %v2654_v29 = vadd.f32 -1.0, %v2948_v49 }
 0x548   : > { %v2059_v41 = vpack.c.bf16 %v2043_v35, %v2039_v21  ;;  %v2044_v58 = vsel %vm1948_vm8, %v3857_v30, %v2028_v36  ;;  %v2952_v34 = vpop.eup %2951  ;;  %v2026_v61 = vmul.f32 1.6732632, %v2651_v57  ;;  %v2655_v12 = vadd.f32 -1.0, %v2950_v63 }
 0x549   : > { %v2029_v10 = vmul.f32 1.6732632, %v2654_v29  ;;  %v2060_v44 = vpack.c.bf16 %v2044_v58, %v2040_v1  ;;  %2965 = vpow2.f32 %v2005_v59  ;;  %v2954_v38 = vpop.eup %2953  ;;  %v2041_v11 = vsel %vm1945_vm9, %v3861_v52, %v2025_v55 }
 0x54a   : > { %v2030_v46 = vmul.f32 1.6732632, %v2655_v12  ;;  %v2656_v60 = vadd.f32 -1.0, %v2952_v34  ;;  %v2042_v8 = vsel %vm1946_vm10, %v3863_v19, %v2026_v61  ;;  %v2657_v20 = vadd.f32 -1.0, %v2954_v38 }
 0x54b   : > { %v2045_v30 = vsel %vm1949_vm11, %v3868_v54, %v2029_v10  ;;  %2107 = vmatprep.subr.bf16.mxu0 %v2060_v44  ;;  %vm1953_vm0 = vcmp.gt.f32.partialorder %v3881_v43, 0.0  ;;  %vm1957_vm1 = vcmp.gt.f32.partialorder %v3892_v14, 0.0  ;;  %vm1952_vm2 = vcmp.gt.f32.partialorder %v3876_v62, 0.0 }
 0x54c   : > { %v2956_v9 = vpop.eup %2955  ;;  %v2061_v6 = vpack.c.bf16 %v2045_v30, %v2041_v11  ;;  %v2046_v42 = vsel %vm1950_vm12, %v3871_v28, %v2030_v46  ;;  %2108 = vmatpush1.bf16.msra.mxu0 %v2059_v41  ;;  %v2031_v26 = vmul.f32 1.6732632, %v2656_v60  ;;  %v2032_v18 = vmul.f32 1.6732632, %v2657_v20 }
 0x54d   : > { %v2958_v50 = vpop.eup %2957  ;;  %v2062_v15 = vpack.c.bf16 %v2046_v42, %v2042_v8  ;;  %v2658_v32 = vadd.f32 -1.0, %v2956_v9  ;;  %vm1956_vm3 = vcmp.gt.f32.partialorder %v3890_v47, 0.0  ;;  %vm1954_vm4 = vcmp.gt.f32.partialorder %v3884_v16, 0.0 }
 0x54e   : > { %v2960_v51 = vpop.eup %2959  ;;  %v2659_v2 = vadd.f32 -1.0, %v2958_v50  ;;  %v2047_v28 = vsel %vm1951_vm13, %v3865_v31, %v2031_v26  ;;  %v2048_v35 = vsel %vm1952_vm2, %v3876_v62, %v2032_v18  ;;  %vm1958_vm5 = vcmp.gt.f32.partialorder %v3901_v17, 0.0  ;;  %v2806_v62 = vld [vmem:[%s4113_s11 + $0x8] sm:$0xff]  }
 0x54f   : > { %v2660_v52 = vadd.f32 -1.0, %v2960_v51  ;;  %2160 = vmatprep.subr.bf16.mxu1 %v2062_v15  ;;  %v2962_v54 = vpop.eup %2961  ;;  %v2033_v23 = vmul.f32 1.6732632, %v2658_v32 }
 0x550   : > { %2161 = vmatpush1.bf16.msra.mxu1 %v2061_v6  ;;  %v2964_v53 = vpop.eup %2963  ;;  %v2662_v19 = vadd.f32 -1.0, %v2962_v54  ;;  %v2034_v48 = vmul.f32 1.6732632, %v2659_v2 }
 0x551   : > { %v2035_v56 = vmul.f32 1.6732632, %v2660_v52  ;;  %v2661_v24 = vadd.f32 -1.0, %v2964_v53  ;;  %v2049_v13 = vsel %vm1953_vm0, %v3881_v43, %v2033_v23 }
 0x552   : > { %v2037_v5 = vmul.f32 1.6732632, %v2662_v19  ;;  %v2050_v45 = vsel %vm1954_vm4, %v3884_v16, %v2034_v48  ;;  %v2074_v16 = vpop.permute.xlu0 %2073 }
 0x553   : > { %v2051_v7 = vsel %vm1955_vm14, %v3878_v37, %v2035_v56  ;;  %v2966_v0 = vpop.eup %2965  ;;  %v2036_v21 = vmul.f32 1.6732632, %v2661_v24 }
 0x554   : > { %v2063_v33 = vpack.c.bf16 %v2051_v7, %v2047_v28  ;;  %v2663_v36 = vadd.f32 -1.0, %v2966_v0  ;;  %v2053_v31 = vsel %vm1957_vm1, %v3892_v14, %v2037_v5  ;;  %v2805_v14 = vld [vmem:[%s4113_s11] sm:$0xff]  }
 0x555   : > { %v2065_v37 = vpack.c.bf16 %v2053_v31, %v2049_v13  ;;  %v2052_v27 = vsel %vm1956_vm3, %v3890_v47, %v2036_v21 }
 0x556   : > { %v2038_v3 = vmul.f32 1.6732632, %v2663_v36  ;;  %v2064_v39 = vpack.c.bf16 %v2052_v27, %v2048_v35  ;;  %v2084_v50 = vpop.permute.xlu0 %2083 }
 0x558   : > { %v2054_v43 = vsel %vm1958_vm5, %v3901_v17, %v2038_v3  ;;  %2109 = vmatprep.subr.bf16.mxu0 %v2064_v39  ;;  %v2079_v17 = vpop.permute.xlu1 %2078 }
 0x559   : > { %v2066_v41 = vpack.c.bf16 %v2054_v43, %v2050_v45  ;;  %2110 = vmatpush1.bf16.msra.mxu0 %v2063_v33 }
 0x55b   : > { %2162 = vmatprep.subr.bf16.mxu1 %v2066_v41 }
 0x55c   : > { %2163 = vmatpush1.bf16.msra.mxu1 %v2065_v37  ;;  %2666 = vmatmul.mubr.msk.bf16.vlgmr.msra.gmra.mrb[40].mxu0 %vm1020_vm15, %v2805_v14  ;;  %v2089_v5 = vpop.permute.xlu1 %2088 }
 0x55d   : > { %2149 = vmatprep.mubr.bf16.mxu0 %v3079_v4 }
 0x55f   : > { %2668 = vmatmul.mubr.msk.bf16.vlgmr.msra.gmra.mrb[40].mxu1 %vm1020_vm15, %v2805_v14 }
 0x560   : > { %2202 = vmatprep.mubr.bf16.mxu1 %v3079_v4 }
 0x564   : > { %2667 = vmatmul.mubr.msk.bf16.gmra.mrb[44].mxu0 %vm1020_vm15, %v2806_v62 }
 0x567   : > { %2669 = vmatmul.mubr.msk.bf16.gmra.mrb[44].mxu1 %vm1020_vm15, %v2806_v62 }
 0x62f   : > { %v2141_v47 = vpop.f32.mrb[40].mxu0 }
 0x630   : > { %v3945_v22 = vadd.f32 %v2141_v47, %v2074_v16  ;;  %v2143_v49 = vpop.f32.mrb[41].mxu0 }
 0x631   : > { %v3947_v25 = vadd.f32 %v2143_v49, %v2074_v16  ;;  %v2145_v40 = vpop.f32.mrb[42].mxu0 }
 0x632   : > { %v2194_v57 = vpop.f32.mrb[40].mxu1  ;;  %v2229_v4 = vmin.f32 %v3945_v22, 0.0  ;;  %v3952_v55 = vadd.f32 %v2145_v40, %v2079_v17  ;;  %v2147_v29 = vpop.f32.mrb[43].mxu0  ;;  %vm2213_vm15 = vcmp.gt.f32.partialorder %v3945_v22, 0.0 }
 0x633   : > { %v3950_v1 = vadd.f32 %v2194_v57, %v2074_v16  ;;  %v2196_v63 = vpop.f32.mrb[41].mxu1  ;;  %v2230_v58 = vmin.f32 %v3947_v25, 0.0  ;;  %v3957_v12 = vadd.f32 %v2147_v29, %v2079_v17  ;;  %vm2214_vm6 = vcmp.gt.f32.partialorder %v3947_v25, 0.0 }
 0x634   : > { %v3955_v34 = vadd.f32 %v2196_v63, %v2074_v16  ;;  %v2198_v61 = vpop.f32.mrb[42].mxu1  ;;  %v2245_v59 = vmul.f32 1.442695, %v2229_v4  ;;  %v2233_v11 = vmin.f32 %v3952_v55, 0.0  ;;  %vm2217_vm9 = vcmp.gt.f32.partialorder %v3952_v55, 0.0 }
 0x635   : > { %v2231_v10 = vmin.f32 %v3950_v1, 0.0  ;;  %v2200_v44 = vpop.f32.mrb[43].mxu1  ;;  %v2247_v46 = vmul.f32 1.442695, %v2230_v58  ;;  %v3962_v60 = vadd.f32 %v2198_v61, %v2079_v17  ;;  %v2234_v8 = vmin.f32 %v3957_v12, 0.0 }
 0x636   : > { %v2232_v38 = vmin.f32 %v3955_v34, 0.0  ;;  %2967 = vpow2.f32 %v2245_v59  ;;  %v2253_v6 = vmul.f32 1.442695, %v2233_v11  ;;  %v3966_v51 = vadd.f32 %v2200_v44, %v2079_v17 }
 0x637   : > { %v2249_v30 = vmul.f32 1.442695, %v2231_v10  ;;  %2969 = vpow2.f32 %v2247_v46  ;;  %v2151_v42 = vpop.f32.mrb[44].mxu0  ;;  %v2235_v15 = vmin.f32 %v3962_v60, 0.0  ;;  %v2255_v26 = vmul.f32 1.442695, %v2234_v8  ;;  %v2332_v10 = vpop.permute.xlu0 %2331 }
 0x638   : > { %v2251_v9 = vmul.f32 1.442695, %v2232_v38  ;;  %v2153_v32 = vpop.f32.mrb[45].mxu0  ;;  %v3968_v20 = vadd.f32 %v2151_v42, %v2084_v50  ;;  %v2236_v53 = vmin.f32 %v3966_v51, 0.0  ;;  %vm2215_vm7 = vcmp.gt.f32.partialorder %v3950_v1, 0.0 }
 0x639   : > { %2971 = vpow2.f32 %v2249_v30  ;;  %v3970_v54 = vadd.f32 %v2153_v32, %v2084_v50  ;;  %v2155_v2 = vpop.f32.mrb[46].mxu0  ;;  %v2257_v56 = vmul.f32 1.442695, %v2235_v15  ;;  %vm2216_vm8 = vcmp.gt.f32.partialorder %v3955_v34, 0.0 }
 0x63a   : > { %2973 = vpow2.f32 %v2251_v9  ;;  %v2204_v52 = vpop.f32.mrb[44].mxu1  ;;  %v2157_v19 = vpop.f32.mrb[47].mxu0  ;;  %v2237_v28 = vmin.f32 %v3968_v20, 0.0  ;;  %v2259_v24 = vmul.f32 1.442695, %v2236_v53  ;;  %v3982_v31 = vadd.f32 %v2155_v2, %v2089_v5 }
 0x63b   : > { %2975 = vpow2.f32 %v2253_v6  ;;  %v2206_v23 = vpop.f32.mrb[45].mxu1  ;;  %v3974_v18 = vadd.f32 %v2204_v52, %v2084_v50  ;;  %v2238_v0 = vmin.f32 %v3970_v54, 0.0  ;;  %vm2218_vm10 = vcmp.gt.f32.partialorder %v3957_v12, 0.0  ;;  %v2337_v53 = vpop.permute.xlu1 %2336 }
 0x63c   : > { %2977 = vpow2.f32 %v2255_v26  ;;  %v2208_v7 = vpop.f32.mrb[46].mxu1  ;;  %v2261_v48 = vmul.f32 1.442695, %v2237_v28  ;;  %v3980_v36 = vadd.f32 %v2206_v23, %v2084_v50  ;;  %v2241_v39 = vmin.f32 %v3982_v31, 0.0 }
 0x63d   : > { %2979 = vpow2.f32 %v2257_v56  ;;  %v2210_v33 = vpop.f32.mrb[47].mxu1  ;;  %v2239_v21 = vmin.f32 %v3974_v18, 0.0  ;;  %v2263_v13 = vmul.f32 1.442695, %v2238_v0  ;;  %v3984_v37 = vadd.f32 %v2208_v7, %v2089_v5 }
 0x63e   : > { %2981 = vpow2.f32 %v2259_v24  ;;  %v2240_v35 = vmin.f32 %v3980_v36, 0.0  ;;  %vm2219_vm11 = vcmp.gt.f32.partialorder %v3962_v60, 0.0  ;;  %v2269_v47 = vmul.f32 1.442695, %v2241_v39 }
 0x63f   : > { %2983 = vpow2.f32 %v2261_v48  ;;  %v2265_v3 = vmul.f32 1.442695, %v2239_v21  ;;  %v2243_v14 = vmin.f32 %v3984_v37, 0.0  ;;  %v3994_v17 = vadd.f32 %v2157_v19, %v2089_v5 }
 0x640   : > { %v2968_v27 = vpop.eup %2967  ;;  %2985 = vpow2.f32 %v2263_v13  ;;  %v2267_v41 = vmul.f32 1.442695, %v2240_v35  ;;  %vm2220_vm12 = vcmp.gt.f32.partialorder %v3966_v51, 0.0  ;;  %v3997_v61 = vadd.f32 %v2210_v33, %v2089_v5 }
 0x641   : > { %v2970_v45 = vpop.eup %2969  ;;  %v2670_v43 = vadd.f32 -1.0, %v2968_v27  ;;  %2987 = vpow2.f32 %v2265_v3  ;;  %v2273_v4 = vmul.f32 1.442695, %v2243_v14  ;;  %vm2221_vm13 = vcmp.gt.f32.partialorder %v3968_v20, 0.0 }
 0x642   : > { %v2671_v16 = vadd.f32 -1.0, %v2970_v45  ;;  %2989 = vpow2.f32 %v2267_v41  ;;  %vm2222_vm14 = vcmp.gt.f32.partialorder %v3970_v54, 0.0  ;;  %vm2223_vm0 = vcmp.gt.f32.partialorder %v3974_v18, 0.0 }
 0x643   : > { %v2972_v62 = vpop.eup %2971  ;;  %v2293_v57 = vmul.f32 1.6732632, %v2670_v43  ;;  %2991 = vpow2.f32 %v2269_v47  ;;  %v2242_v2 = vmin.f32 %v3994_v17, 0.0  ;;  %vm2224_vm1 = vcmp.gt.f32.partialorder %v3980_v36, 0.0 }
 0x644   : > { %v2974_v49 = vpop.eup %2973  ;;  %v2672_v40 = vadd.f32 -1.0, %v2972_v62  ;;  %v2294_v29 = vmul.f32 1.6732632, %v2671_v16  ;;  %2993 = vpow2.f32 %v2273_v4  ;;  %v2342_v62 = vpop.permute.xlu0 %2341  ;;  %vm2225_vm2 = vcmp.gt.f32.partialorder %v3982_v31, 0.0 }
 0x645   : > { %v2976_v63 = vpop.eup %2975  ;;  %v2673_v58 = vadd.f32 -1.0, %v2974_v49  ;;  %v2309_v44 = vsel %vm2213_vm15, %v3945_v22, %v2293_v57  ;;  %vm2227_vm3 = vcmp.gt.f32.partialorder %v3984_v37, 0.0  ;;  %vm2226_vm4 = vcmp.gt.f32.partialorder %v3994_v17, 0.0 }
 0x646   : > { %v2978_v59 = vpop.eup %2977  ;;  %v2295_v46 = vmul.f32 1.6732632, %v2672_v40  ;;  %v2674_v38 = vadd.f32 -1.0, %v2976_v63  ;;  %v2349_v30 = vmul.f32 %v2332_v10, %v2309_v44  ;;  %v2310_v9 = vsel %vm2214_vm6, %v3947_v25, %v2294_v29 }
 0x647   : > { %v2980_v11 = vpop.eup %2979  ;;  %v2296_v6 = vmul.f32 1.6732632, %v2673_v58  ;;  %v2675_v8 = vadd.f32 -1.0, %v2978_v59  ;;  %v2350_v22 = vmul.f32 %v2332_v10, %v2310_v9  ;;  %v2244_v9 = vmin.f32 %v3997_v61, 0.0 }
 0x648   : > { %v2311_v42 = vsel %vm2215_vm7, %v3950_v1, %v2295_v46  ;;  %v2297_v50 = vmul.f32 1.6732632, %v2674_v38  ;;  %v2676_v15 = vadd.f32 -1.0, %v2980_v11  ;;  %v2982_v32 = vpop.eup %2981  ;;  %vm2228_vm5 = vcmp.gt.f32.partialorder %v3997_v61, 0.0 }
 0x649   : > { %v2351_v26 = vmul.f32 %v2332_v10, %v2311_v42  ;;  %v2312_v52 = vsel %vm2216_vm8, %v3955_v34, %v2296_v6  ;;  %v2298_v25 = vmul.f32 1.6732632, %v2675_v8  ;;  %v2984_v56 = vpop.eup %2983  ;;  %v2677_v28 = vadd.f32 -1.0, %v2982_v32 }
 0x64a   : > { %v2352_v23 = vmul.f32 %v2332_v10, %v2312_v52  ;;  %v2313_v1 = vsel %vm2217_vm9, %v3952_v55, %v2297_v50  ;;  %v2299_v19 = vmul.f32 1.6732632, %v2676_v15  ;;  %v2986_v7 = vpop.eup %2985  ;;  %v2678_v33 = vadd.f32 -1.0, %v2984_v56 }
 0x64b   : > { %v2353_v24 = vmul.f32 %v2337_v53, %v2313_v1  ;;  %v2314_v0 = vsel %vm2218_vm10, %v3957_v12, %v2298_v25  ;;  %v2271_v34 = vmul.f32 1.442695, %v2242_v2  ;;  %v2988_v5 = vpop.eup %2987  ;;  %v2300_v13 = vmul.f32 1.6732632, %v2677_v28 }
 0x64c   : > { %v2315_v48 = vsel %vm2219_vm11, %v3962_v60, %v2299_v19  ;;  %v2354_v21 = vmul.f32 %v2337_v53, %v2314_v0  ;;  %v2679_v55 = vadd.f32 -1.0, %v2986_v7  ;;  %v2301_v27 = vmul.f32 1.6732632, %v2678_v33  ;;  %v2990_v45 = vpop.eup %2989 }
 0x64d   : > { %v2365_v3 = vadd.f32 %v2353_v24, %v2349_v30  ;;  %v2355_v35 = vmul.f32 %v2337_v53, %v2315_v48  ;;  %v2680_v39 = vadd.f32 -1.0, %v2988_v5  ;;  %v2316_v12 = vsel %vm2220_vm12, %v3966_v51, %v2300_v13  ;;  %v2992_v14 = vpop.eup %2991  ;;  %v2405_v5 = vpop.permute.xlu0 %2404 }
 0x64e   : > { %v2374_v43 = vadd.f32 %v2354_v21, %v2350_v22  ;;  %v2302_v41 = vmul.f32 1.6732632, %v2679_v55  ;;  %2995 = vpow2.f32 %v2271_v34  ;;  %v2356_v47 = vmul.f32 %v2337_v53, %v2316_v12  ;;  %v2994_v57 = vpop.eup %2993 }
 0x64f   : > { %v2383_v16 = vadd.f32 %v2355_v35, %v2351_v26  ;;  %v2317_v60 = vsel %vm2221_vm13, %v3968_v20, %v2301_v27  ;;  %v2303_v49 = vmul.f32 1.6732632, %v2680_v39  ;;  %v2681_v63 = vadd.f32 -1.0, %v2990_v45 }
 0x650   : > { %v2357_v40 = vmul.f32 %v2342_v62, %v2317_v60  ;;  %v2318_v4 = vsel %vm2222_vm14, %v3970_v54, %v2302_v41  ;;  %v2682_v29 = vadd.f32 -1.0, %v2992_v14  ;;  %v2392_v51 = vadd.f32 %v2356_v47, %v2352_v23  ;;  %v2347_v54 = vpop.permute.xlu1 %2346 }
 0x651   : > { %v2319_v58 = vsel %vm2223_vm0, %v3974_v18, %v2303_v49  ;;  %v2358_v59 = vmul.f32 %v2342_v62, %v2318_v4  ;;  %v2684_v10 = vadd.f32 -1.0, %v2994_v57  ;;  %v2304_v38 = vmul.f32 1.6732632, %v2681_v63 }
 0x652   : > { %v2366_v44 = vadd.f32 %v2365_v3, %v2357_v40  ;;  %v2359_v46 = vmul.f32 %v2342_v62, %v2319_v58  ;;  %v2305_v20 = vmul.f32 1.6732632, %v2682_v29  ;;  %v2275_v15 = vmul.f32 1.442695, %v2244_v9 }
 0x653   : > { %v2375_v11 = vadd.f32 %v2374_v43, %v2358_v59  ;;  %v2307_v30 = vmul.f32 1.6732632, %v2684_v10  ;;  %v2320_v8 = vsel %vm2224_vm1, %v3980_v36, %v2304_v38  ;;  %v2407_v26 = vlaneseq }
 0x654   : > { %v2384_v6 = vadd.f32 %v2383_v16, %v2359_v46  ;;  %v2321_v18 = vsel %vm2225_vm2, %v3982_v31, %v2305_v20  ;;  %v2360_v42 = vmul.f32 %v2342_v62, %v2320_v8  ;;  %2997 = vpow2.f32 %v2275_v15 }
 0x655   : > { %v2361_v22 = vmul.f32 %v2347_v54, %v2321_v18  ;;  %v2323_v50 = vsel %vm2227_vm3, %v3984_v37, %v2307_v30  ;;  %v4046_v36 = vshrl.u32 %v2407_v26, 7  ;;  %vm2470_vm15 = vcmp.lt.s32.totalorder %v2407_v26, 512 }
 0x656   : > { %v2363_v32 = vmul.f32 %v2347_v54, %v2323_v50  ;;  %v2393_v52 = vadd.f32 %v2392_v51, %v2360_v42  ;;  %v3080_v50 = vmov 1966171168  }
 0x657   : > { %v2367_v25 = vadd.f32 %v2366_v44, %v2361_v22  ;;  %v2409_v33 = vsub.s32 0, %v4046_v36  ;;  %v2446_v15 = vunpack.c.l.s4 %v3080_v50 }
 0x658   : > { %v2996_v2 = vpop.eup %2995  ;;  %v2385_v56 = vadd.f32 %v2384_v6, %v2363_v32 }
 0x659   : > { %v2368_v53 = vrot.slane %v2367_v25, 4  ;;  %v2683_v23 = vadd.f32 -1.0, %v2996_v2  ;;  %v2410_v27 = vrot.slane %v2405_v5, %v2409_v33 }
 0x65a   : > { %v2386_v1 = vrot.slane %v2385_v56, 4 }
 0x65b   : > { %v2369_v31 = vadd.f32 %v2368_v53, %v2367_v25  ;;  %v2306_v19 = vmul.f32 1.6732632, %v2683_v23  ;;  %v2447_v25 = vunpack.c.0.s8 %v2446_v15 }
 0x65c   : > { %v2387_v28 = vadd.f32 %v2386_v1, %v2385_v56 }
 0x65d   : > { %v2370_v37 = vrot.slane %v2369_v31, 2  ;;  %v2322_v7 = vsel %vm2226_vm4, %v3994_v17, %v2306_v19  ;;  %v2450_v2 = vsub.s32 %v2447_v25, %v4046_v36 }
 0x65e   : > { %v2388_v24 = vrot.slane %v2387_v28, 2  ;;  %v2362_v0 = vmul.f32 %v2347_v54, %v2322_v7  ;;  %v2998_v21 = vpop.eup %2997 }
 0x65f   : > { %v2371_v34 = vadd.f32 %v2370_v37, %v2369_v31  ;;  %v2685_v35 = vadd.f32 -1.0, %v2998_v21 }
 0x660   : > { %v2376_v48 = vadd.f32 %v2375_v11, %v2362_v0  ;;  %v2389_v55 = vadd.f32 %v2388_v24, %v2387_v28 }
 0x661   : > { %v2372_v13 = vrot.slane %v2371_v34, 1  ;;  %v2308_v43 = vmul.f32 1.6732632, %v2685_v35 }
 0x662   : > { %v2377_v3 = vrot.slane %v2376_v48, 4  ;;  %v2390_v41 = vrot.slane %v2389_v55, 1 }
 0x663   : > { %v2373_v39 = vadd.f32 %v2372_v13, %v2371_v34  ;;  %v2324_v14 = vsel %vm2228_vm5, %v3997_v61, %v2308_v43 }
 0x664   : > { %v2378_v45 = vadd.f32 %v2377_v3, %v2376_v48  ;;  %v2364_v62 = vmul.f32 %v2347_v54, %v2324_v14  ;;  %v2391_v60 = vadd.f32 %v2390_v41, %v2389_v55 }
 0x665   : > { %v2411_v12 = vadd.f32 %v2410_v27, %v2373_v39 }
 0x666   : > { %v2379_v17 = vrot.slane %v2378_v45, 2  ;;  %v2394_v49 = vadd.f32 %v2393_v52, %v2364_v62  ;;  %v2413_v63 = vadd.f32 %v2410_v27, %v2391_v60 }
 0x667   : > { %v2686_v16 = vmul.f32 -1.442695, %v2411_v12 }
 0x668   : > { %v2380_v47 = vadd.f32 %v2379_v17, %v2378_v45  ;;  %v2395_v40 = vrot.slane %v2394_v49, 4  ;;  %v2688_v10 = vmul.f32 -1.442695, %v2413_v63 }
 0x669   : > { %2999 = vpow2.f32 %v2686_v16 }
 0x66a   : > { %v2381_v57 = vrot.slane %v2380_v47, 1  ;;  %v2396_v29 = vadd.f32 %v2395_v40, %v2394_v49 }
 0x66c   : > { %v2382_v4 = vadd.f32 %v2381_v57, %v2380_v47  ;;  %v2397_v58 = vrot.slane %v2396_v29, 2 }
 0x66e   : > { %v2412_v51 = vadd.f32 %v2410_v27, %v2382_v4  ;;  %v2398_v44 = vadd.f32 %v2397_v58, %v2396_v29 }
 0x670   : > { %v2687_v59 = vmul.f32 -1.442695, %v2412_v51  ;;  %v2399_v46 = vrot.slane %v2398_v44, 1 }
 0x672   : > { %3001 = vpow2.f32 %v2687_v59  ;;  %v2400_v61 = vadd.f32 %v2399_v46, %v2398_v44 }
 0x673   : > { %3003 = vpow2.f32 %v2688_v10  ;;  %v3000_v38 = vpop.eup %2999 }
 0x674   : > { %v2414_v20 = vadd.f32 %v2410_v27, %v2400_v61  ;;  %v2427_v11 = vadd.f32 1.0, %v3000_v38 }
 0x676   : > { %v2689_v30 = vmul.f32 -1.442695, %v2414_v20 }
 0x678   : > { %3005 = vpow2.f32 %v2689_v30 }
 0x679   : > { %3007 = vrcp.f32 %v2427_v11 }
 0x67c   : > { %v3002_v9 = vpop.eup %3001 }
 0x67d   : > { %v2428_v54 = vadd.f32 1.0, %v3002_v9  ;;  %v3004_v6 = vpop.eup %3003 }
 0x67e   : > { %v2429_v8 = vadd.f32 1.0, %v3004_v6 }
 0x67f   : > { %3009 = vrcp.f32 %v2428_v54 }
 0x680   : > { %3011 = vrcp.f32 %v2429_v8 }
 0x682   : > { %v3006_v18 = vpop.eup %3005 }
 0x683   : > { %v2430_v42 = vadd.f32 1.0, %v3006_v18  ;;  %v3008_v22 = vpop.eup %3007 }
 0x685   : > { %3013 = vrcp.f32 %v2430_v42 }
 0x689   : > { %v3010_v32 = vpop.eup %3009 }
 0x68a   : > { %v2443_v52 = vcombine.low %v3008_v22, %v3010_v32  ;;  %v3012_v56 = vpop.eup %3011 }
 0x68c   : > { %v2451_v1 = vrot.slane %v2443_v52, %v2450_v2 }
 0x68f   : > { %v3014_v53 = vpop.eup %3013 }
 0x690   : > { %v2444_v23 = vcombine.low %v3012_v56, %v3014_v53 }
 0x692   : > { %v2458_v31 = vrot.slane %v2444_v23, %v2450_v2 }
 0x694   : > { %v2459_v19 = vcombine.low %v2451_v1, %v2458_v31 }
 0x696   : > { %v2466_v28 = vrot.slane %v2459_v19, %v2450_v2 }
 0x698   : > { %2472 = vst.msk [vmem:[%s502_s19] sm:$0xf] %vm2470_vm15, %v2466_v28 }
 0x699   : > { %3028 = shalt.err (!%p3025_p3)
}
 0x69a   : > { %s3029_s16 = scalar_lea.hbm %s4060_s28, 64  ;;  %s3033_s14 = scalar_lea.hbm %s4117_s15, 128 }
 0x69b   : > { %p3030_p4 = scmp.ne.s32.totalorder %s4060_s28, %s3029_s16  ;;  %p3034_p9 = scmp.lt.u32.totalorder %s4060_s28, %s4117_s15 }
 0x69c   : > { %p3035_p10 = scmp.lt.u32.totalorder %s3033_s14, %s3029_s16  ;;  %p3037_p12 = scmp.lt.u32.totalorder %s3029_s16, %s4060_s28 }
 0x69d   : > { %p3031_p7 = pnand %p3030_p4, %p3200_p5 }
 0x69e   : > { %p3036_p11 = por %p3035_p10, %p3034_p9 }
 0x69f   : > { %p3032_p8 = pneg %p3031_p7 }
 0x6a0   : > { %p3038_p13 = por %p3037_p12, %p3036_p11 }
 0x6a2   : > { %p3039_p0 = pnand %p3038_p13, %p3032_p8 }
 0x6a4   : > { %3042 = shalt.err (!%p3039_p0)
}
 0x6a5   : > { %2752 = dma.vmem_to_hbm [thread:$0]  (%p3200_p5), %s4062_s26, 64, %s4060_s28, %s2474_s24  }
 0x6a6 PF: > { %p2758_p1 = scmp.ge.s32.totalorder %s3077_s23, 2  ;;  %s2500_s1 = sand.u32 1, %s3065_s20  }
 0x6a7   : > { %s2501_s27 = scalar_lea.sflag [#allocation4], %s2500_s1 }
 0x6a8   : > { %p2755_p2 = pnand %p2758_p1, %p3204_p6 }
 0x6aa   : > { %3060 = dma.done.wait (!%p2755_p2), %s2501_s27, 64  }
 0x6ab   : > { %3062 = vsyncadd (!%p2755_p2), %s2501_s27, 4294967232  ;;  %s4127_s18 = sld [smem:[#allocation6_spill]]  ;;  %s4128_s22 = sld [smem:[#allocation7_spill]] }
 0x6ac   : > { %p27_p3 = scmp.ge.s32.totalorder %s3188_s25, 4   ;;  %s4129_s20 = smov %s3069_s21 }
 0x6ad   : > { %s4131_s23 = smov %s3188_s25 }
 0x6ae   :  { %29 = sbr.rel (!%p27_p3) target bundleno = 6 (0x6), region = 115 }
 0x6b1   : > { %s4130_s21 = smov %s4127_s18 }
 0x6b5   :  { %2506 = vsyncpa [#allocation4], 1 }
 0x6b6   :  { %2508 = vsyncpa [#allocation4 + $0x1], 1 }

</bundles_post_ra>
